<compile_context>
chip_gen: v7x
topology: tpu7x:2x2x1
jax: 0.10.0
libtpu: 0.0.40
codegen_flags: <defaults>
</compile_context>

<pallas_src>
import functools

import jax
import jax.numpy as jnp
from jax.experimental import pallas as pl
from jax.experimental.pallas import tpu as pltpu


_SENTINEL = 1e30   # larger than any real projected value; sentinel-sentinel diff == 0


# ----------------------------------------------------------------------------
# helpers
# ----------------------------------------------------------------------------
def _next_pow2(v):
    return 1 if v <= 1 else 1 << (v - 1).bit_length()


def _round_up(v, m):
    return ((v + m - 1) // m) * m


def _abs_pow(ad, degree):
    """|diff|^degree with cheap special cases (EUP pow only for fractional degrees)."""
    deg = float(degree)
    if deg == 1.0:
        return ad
    if deg == 2.0:
        return ad * ad
    if deg == float(int(deg)) and 2.0 < deg <= 8.0:
        out = ad
        for _ in range(int(deg) - 1):
            out = out * ad
        return out
    return ad ** deg


def _bitonic_sort_lanes(v, lane, n):
    """Ascending bitonic sort of v along its last (lane) axis.  n must be a power of two.

    Compare/select runs on the VPU; the lane exchanges use pltpu.roll (XLU slot).
    `lane` is a precomputed int32 iota of v.shape along the last axis.
    """
    k = 2
    while k <= n:
        j = k // 2
        while j >= 1:
            up = pltpu.roll(v, n - j, 1)        # value at lane + j
            dn = pltpu.roll(v, j, 1)            # value at lane - j
            is_lower = (lane & j) == 0
            partner = jnp.where(is_lower, up, dn)
            if k == n:                          # final merge: globally ascending
                take_min = is_lower
            else:
                take_min = is_lower == ((lane & k) == 0)
            v = jnp.where(take_min, jnp.minimum(v, partner), jnp.maximum(v, partner))
            j //= 2
        k *= 2
    return v


# ----------------------------------------------------------------------------
# fused kernel: project (x & y) -> stacked sort -> |diff|^degree -> moments
# ----------------------------------------------------------------------------
def _asw_fused_kernel(proj_ref, xT_ref, yT_ref, first_ref, second_ref, *,
                      degree, n_true, n_pad, p_true, p_pad, tp):
    pt = pl.program_id(1)

    @pl.when(pt == 0)
    def _init():
        first_ref[...] = jnp.zeros_like(first_ref)
        second_ref[...] = jnp.zeros_like(second_ref)

    # --- normalize projections once, project both clouds (VPU broadcast-sum; K=3) ---
    proj = proj_ref[...]                                          # (TP, D)
    inv_norm = jax.lax.rsqrt(jnp.sum(proj * proj, axis=-1, keepdims=True))
    proj = proj * inv_norm
    xT = xT_ref[...]                                              # (D, N_pad) lane-dense
    yT = yT_ref[...]
    d_dim = xT.shape[0]
    xs = proj[:, 0:1] * xT[0:1, :]
    ys = proj[:, 0:1] * yT[0:1, :]
    for d in range(1, d_dim):
        xs = xs + proj[:, d:d + 1] * xT[d:d + 1, :]
        ys = ys + proj[:, d:d + 1] * yT[d:d + 1, :]

    # --- stack x/y projections along sublanes: ONE sort network handles both clouds ---
    z = jnp.concatenate([xs, ys], axis=0)                         # (2*TP, N_pad)

    # --- padded lanes -> large sentinel so they pair with each other after sorting ---
    lane = jax.lax.broadcasted_iota(jnp.int32, (2 * tp, n_pad), 1)
    if n_pad != n_true:
        z = jnp.where(lane >= n_true, _SENTINEL, z)

    # --- in-VMEM sort along the point axis (no HBM round trip for the intermediates) ---
    z = _bitonic_sort_lanes(z, lane, n_pad)

    # --- transport cost per projection, then moments over projections ---
    diff = z[:tp, :] - z[tp:, :]                                  # sorted(x) - sorted(y)
    p = _abs_pow(jnp.abs(diff), degree)
    s = jnp.sum(p, axis=-1, keepdims=True)                        # (TP, 1)
    if p_pad != p_true:                                           # mask padded proj rows
        row = jax.lax.broadcasted_iota(jnp.int32, (tp, 1), 0)
        s = jnp.where(pt * tp + row < p_true, s, 0.0)

    first_ref[...] += jnp.sum(s, axis=0, keepdims=True)
    second_ref[...] += jnp.sum(s * s, axis=0, keepdims=True)

    @pl.when(pt == pl.num_programs(1) - 1)
    def _finalize():
        inv_p = jnp.float32(1.0 / p_true)
        first_ref[...] = first_ref[...] * inv_p
        second_ref[...] = second_ref[...] * inv_p


def _choose_tp(p, n_pad):
    """Projection tile size: largest single tile that keeps sort intermediates in VMEM."""
    if n_pad <= 2048:
        cap = 64
    elif n_pad <= 8192:
        cap = 32
    elif n_pad <= 32768:
        cap = 8
    else:
        cap = 4
    if p <= cap:
        return p, p                       # single tile, no padded projection rows
    return cap, _round_up(p, cap)


def asw_fused_moments(xT, yT, projs, *, n_true, degree):
    """xT, yT: [B, D, N_pad] f32; projs: [B, P, D] f32 (unnormalized).

    Returns (first_moment [B], second_moment [B]) of sum_n |sorted diff|^degree."""
    B, D, n_pad = xT.shape
    _, p_true, _ = projs.shape
    tp, p_pad = _choose_tp(int(p_true), int(n_pad))
    if p_pad != p_true:                   # unit-vector filler rows (avoid rsqrt(0))
        extra = jnp.zeros((B, p_pad - p_true, D), jnp.float32).at[:, :, 0].set(1.0)
        projs = jnp.concatenate([projs, extra], axis=1)
    num_pt = p_pad // tp

    kernel = functools.partial(
        _asw_fused_kernel, degree=float(degree), n_true=int(n_true), n_pad=int(n_pad),
        p_true=int(p_true), p_pad=int(p_pad), tp=int(tp))

    first, second = pl.pallas_call(
        kernel,
        out_shape=(jax.ShapeDtypeStruct((B, 1, 1), jnp.float32),
                   jax.ShapeDtypeStruct((B, 1, 1), jnp.float32)),
        grid=(B, num_pt),
        in_specs=[
            pl.BlockSpec((pl.Squeezed(), tp, D), lambda b, pt: (b, pt, 0)),
            pl.BlockSpec((pl.Squeezed(), D, n_pad), lambda b, pt: (b, 0, 0)),
            pl.BlockSpec((pl.Squeezed(), D, n_pad), lambda b, pt: (b, 0, 0)),
        ],
        out_specs=(
            pl.BlockSpec((pl.Squeezed(), 1, 1), lambda b, pt: (b, 0, 0)),
            pl.BlockSpec((pl.Squeezed(), 1, 1), lambda b, pt: (b, 0, 0)),
        ),
        compiler_params=pltpu.CompilerParams(
            dimension_semantics=("parallel", "arbitrary"),
            vmem_limit_bytes=40 * 1024 * 1024,
        ),
    )(projs, xT, yT)
    return first[:, 0, 0], second[:, 0, 0]


# ----------------------------------------------------------------------------
# wrappers (layout prep + random projections)
# ----------------------------------------------------------------------------
def _prep_points(x, y):
    """Transpose to [B, D, N] (points on the lane axis) and pad N to pow2 >= 128."""
    B, N, D = x.shape
    n_pad = max(128, _next_pow2(N))
    xT = jnp.swapaxes(x.astype(jnp.float32), 1, 2)
    yT = jnp.swapaxes(y.astype(jnp.float32), 1, 2)
    if n_pad != N:
        cfg = ((0, 0), (0, 0), (0, n_pad - N))
        xT = jnp.pad(xT, cfg)
        yT = jnp.pad(yT, cfg)
    return xT, yT, N


@functools.partial(jax.jit, static_argnums=(3, 4))
def compute_practical_moments_sw(x, y, key, num_projections=30, degree=2.0):
    """x, y: [B, N, 3].  Returns (first_moment [B], second_moment [B])."""
    B, N, D = x.shape
    xT, yT, n_true = _prep_points(x, y)
    projs = jax.random.normal(key, (B, num_projections, D), dtype=jnp.float32)
    return asw_fused_moments(xT, yT, projs, n_true=n_true, degree=degree)


# ----------------------------------------------------------------------------
# full forward: on-device adaptive loop (lax.while_loop, no host sync per slice)
# ----------------------------------------------------------------------------
@functools.partial(jax.jit, static_argnames=(
    "init_projs", "step_projs", "max_slices", "degree", "k", "loop_rate_thresh"))
def _asw_forward(x, y, key, epsilon, *, init_projs, step_projs, max_slices,
                 degree, k, loop_rate_thresh):
    B, N, D = x.shape
    xT, yT, n_true = _prep_points(x, y)
    eps2 = jnp.asarray(epsilon, jnp.float32) ** 2
    k2 = float(k) ** 2

    def moments(rng, num_projs):
        projs = jax.random.normal(rng, (B, num_projs, D), dtype=jnp.float32)
        return asw_fused_moments(xT, yT, projs, n_true=n_true, degree=degree)

    def loop_rate(first, second, n):
        cond = k2 * (second - first ** 2) > (n.astype(jnp.float32) - 1.0) * eps2
        return jnp.mean(cond.astype(jnp.float32))

    key, sub = jax.random.split(key)
    first, second = moments(sub, init_projs)
    n0 = jnp.int32(init_projs)

    def cond_fn(carry):
        _, f, s, n = carry
        return jnp.logical_and(loop_rate(f, s, n) > loop_rate_thresh,
                               n + step_projs <= max_slices)

    def body_fn(carry):
        rng, f, s, n = carry
        rng, sub = jax.random.split(rng)
        f_s, s_s = moments(sub, step_projs)
        nf = n.astype(jnp.float32)
        f = (nf * f + step_projs * f_s) / (nf + step_projs)
        s = (nf * s + step_projs * s_s) / (nf + step_projs)
        return rng, f, s, n + jnp.int32(step_projs)

    _, first, second, n = jax.lax.while_loop(cond_fn, body_fn, (key, first, second, n0))
    return first, second, n


class ASW:
    """Adaptive sliced Wasserstein estimator (fused Pallas TPU backend, forward only)."""

    def __init__(self, init_projs=2, step_projs=1, k=2.0, loop_rate_thresh=0.05,
                 projs_history="projs_history.txt", max_slices=500, **kwargs):
        self.init_projs = init_projs
        self.step_projs = step_projs
        self.k = k
        self.loop_rate_thresh = loop_rate_thresh
        self.projs_history = projs_history
        self.max_slices = max_slices

    def forward(self, x, y, **kwargs):
        if "epsilon" not in kwargs:
            raise ValueError("Epsilon not found.")
        epsilon = kwargs["epsilon"]
        degree = kwargs["degree"]
        key = kwargs.get("key", jax.random.PRNGKey(0))
        first, second, n = _asw_forward(
            x, y, key, jnp.asarray(epsilon, jnp.float32),
            init_projs=int(self.init_projs), step_projs=int(self.step_projs),
            max_slices=int(self.max_slices), degree=float(degree),
            k=float(self.k), loop_rate_thresh=float(self.loop_rate_thresh))
        # TODO(synk): original appends num_slices to projs_history.txt; host file I/O omitted.
        return {"loss": jnp.mean(first), "num_slices": int(n)}

    __call__ = forward


# ----------------------------------------------------------------------------
# pure-JAX reference (mirrors the PyTorch compute_practical_moments_sw) + demo
# ----------------------------------------------------------------------------
def _reference_moments(x, y, key, num_projections, degree):
    B, N, D = x.shape
    projs = jax.random.normal(key, (B, num_projections, D), dtype=jnp.float32)
    projs = projs / jnp.sqrt(jnp.sum(projs ** 2, axis=2, keepdims=True))
    xproj = jnp.sum(x[:, None, :, :] * projs[:, :, None, :], axis=-1)   # (B, P, N)
    yproj = jnp.sum(y[:, None, :, :] * projs[:, :, None, :], axis=-1)
    diff = jnp.sort(xproj, axis=-1) - jnp.sort(yproj, axis=-1)
    s = jnp.sum(jnp.abs(diff) ** degree, axis=-1)
    return jnp.mean(s, axis=1), jnp.mean(s ** 2, axis=1)


if __name__ == "__main__":
    key = jax.random.PRNGKey(0)
    kx, ky, kp, kf = jax.random.split(key, 4)

    B, N, D = 2, 16, 3                       # batch, points per cloud, point dim
    x = jax.random.normal(kx, (B, N, D), dtype=jnp.float32)
    y = jax.random.normal(ky, (B, N, D), dtype=jnp.float32)

    # Correctness check of the fused kernel against the pure-JAX reference.
    first, second = compute_practical_moments_sw(x, y, kp, 8, 2.0)
    ref_first, ref_second = _reference_moments(x, y, kp, 8, 2.0)
    jax.block_until_ready((first, second))
    assert jnp.allclose(first, ref_first, rtol=1e-3, atol=1e-3), (first, ref_first)
    assert jnp.allclose(second, ref_second, rtol=1e-3, atol=1e-3), (second, ref_second)

    # Full adaptive forward.
    asw = ASW(init_projs=2, step_projs=1, k=2.0, loop_rate_thresh=0.05, max_slices=32)
    out = asw(x, y, epsilon=0.5, degree=2.0, key=kf)
    jax.block_until_ready(out["loss"])
    assert jnp.isfinite(out["loss"])
    print("KERNEL_OK")
</pallas_src>

<mosaic_0001>
module attributes {stable_mosaic.version = 11 : i64} {
  func.func @_asw_fused_kernel(%arg0: i32, %arg1: i32, %arg2: memref<1x8x3xf32, #tpu.memory_space<vmem>>, %arg3: memref<1x3x128xf32, #tpu.memory_space<vmem>>, %arg4: memref<1x3x128xf32, #tpu.memory_space<vmem>>, %arg5: memref<1x1x1xf32, #tpu.memory_space<vmem>>, %arg6: memref<1x1x1xf32, #tpu.memory_space<vmem>>) attributes {dimension_semantics = [#tpu.dimension_semantics<parallel>, #tpu.dimension_semantics<arbitrary>], iteration_bounds = array<i64: 2, 1>, scalar_prefetch = 0 : i64, scratch_operands = 0 : i64, tpu.core_type = #tpu.core_type<tc>, window_params = [{transform_indices = @transform_0, window_bounds = array<i64: 1, 8, 3>}, {transform_indices = @transform_1, window_bounds = array<i64: 1, 3, 128>}, {transform_indices = @transform_2, window_bounds = array<i64: 1, 3, 128>}, {transform_indices = @transform_3, window_bounds = array<i64: 1, 1, 1>}, {transform_indices = @transform_4, window_bounds = array<i64: 1, 1, 1>}]} {
    %c0_i32 = arith.constant 0 : i32
    %0 = arith.cmpi eq, %arg1, %c0_i32 : i32
    %1 = arith.extui %0 : i1 to i32
    %c0_i32_0 = arith.constant 0 : i32
    %2 = arith.cmpi ne, %1, %c0_i32_0 : i32
    scf.if %2 {
      %cst_190 = arith.constant 0.000000e+00 : f32
      %488 = vector.broadcast %cst_190 : f32 to vector<1x1xf32>
      %c0_191 = arith.constant 0 : index
      %c0_192 = arith.constant 0 : index
      %c0_193 = arith.constant 0 : index
      %489 = vector.load %arg5[%c0_191, %c0_192, %c0_193] : memref<1x1x1xf32, #tpu.memory_space<vmem>>, vector<1x1x1xf32>
      %490 = vector.shape_cast %489 : vector<1x1x1xf32> to vector<1x1xf32>
      %491 = vector.shape_cast %488 : vector<1x1xf32> to vector<1x1x1xf32>
      tpu.vector_store %arg5[%c0_191, %c0_192, %c0_193], %491 {strides = array<i32>} : memref<1x1x1xf32, #tpu.memory_space<vmem>>, vector<1x1x1xf32>,
      %cst_194 = arith.constant 0.000000e+00 : f32
      %492 = vector.broadcast %cst_194 : f32 to vector<1x1xf32>
      %c0_195 = arith.constant 0 : index
      %c0_196 = arith.constant 0 : index
      %c0_197 = arith.constant 0 : index
      %493 = vector.load %arg6[%c0_195, %c0_196, %c0_197] : memref<1x1x1xf32, #tpu.memory_space<vmem>>, vector<1x1x1xf32>
      %494 = vector.shape_cast %493 : vector<1x1x1xf32> to vector<1x1xf32>
      %495 = vector.shape_cast %492 : vector<1x1xf32> to vector<1x1x1xf32>
      tpu.vector_store %arg6[%c0_195, %c0_196, %c0_197], %495 {strides = array<i32>} : memref<1x1x1xf32, #tpu.memory_space<vmem>>, vector<1x1x1xf32>,
    } else {
    }
    %c0 = arith.constant 0 : index
    %c0_1 = arith.constant 0 : index
    %c0_2 = arith.constant 0 : index
    %3 = vector.load %arg2[%c0, %c0_1, %c0_2] : memref<1x8x3xf32, #tpu.memory_space<vmem>>, vector<1x8x3xf32>
    %4 = vector.shape_cast %3 : vector<1x8x3xf32> to vector<8x3xf32>
    %5 = arith.mulf %4, %4 : vector<8x3xf32>
    %cst = arith.constant dense<0.000000e+00> : vector<8xf32>
    %6 = vector.multi_reduction <add>, %5, %cst [1] : vector<8x3xf32> to vector<8xf32>
    %7 = vector.shape_cast %6 : vector<8xf32> to vector<8x1xf32>
    %8 = math.rsqrt %7 : vector<8x1xf32>
    %9 = vector.broadcast %8 : vector<8x1xf32> to vector<8x3xf32>
    %10 = arith.mulf %4, %9 : vector<8x3xf32>
    %c0_3 = arith.constant 0 : index
    %c0_4 = arith.constant 0 : index
    %c0_5 = arith.constant 0 : index
    %11 = vector.load %arg3[%c0_3, %c0_4, %c0_5] : memref<1x3x128xf32, #tpu.memory_space<vmem>>, vector<1x3x128xf32>
    %12 = vector.shape_cast %11 : vector<1x3x128xf32> to vector<3x128xf32>
    %c0_6 = arith.constant 0 : index
    %c0_7 = arith.constant 0 : index
    %c0_8 = arith.constant 0 : index
    %13 = vector.load %arg4[%c0_6, %c0_7, %c0_8] : memref<1x3x128xf32, #tpu.memory_space<vmem>>, vector<1x3x128xf32>
    %14 = vector.shape_cast %13 : vector<1x3x128xf32> to vector<3x128xf32>
    %15 = vector.extract_strided_slice %10 {offsets = [0, 0], sizes = [8, 1], strides = [1, 1]} : vector<8x3xf32> to vector<8x1xf32>
    %16 = vector.extract_strided_slice %12 {offsets = [0, 0], sizes = [1, 128], strides = [1, 1]} : vector<3x128xf32> to vector<1x128xf32>
    %17 = vector.broadcast %15 : vector<8x1xf32> to vector<8x128xf32>
    %18 = vector.broadcast %16 : vector<1x128xf32> to vector<8x128xf32>
    %19 = arith.mulf %17, %18 : vector<8x128xf32>
    %20 = vector.extract_strided_slice %10 {offsets = [0, 0], sizes = [8, 1], strides = [1, 1]} : vector<8x3xf32> to vector<8x1xf32>
    %21 = vector.extract_strided_slice %14 {offsets = [0, 0], sizes = [1, 128], strides = [1, 1]} : vector<3x128xf32> to vector<1x128xf32>
    %22 = vector.broadcast %20 : vector<8x1xf32> to vector<8x128xf32>
    %23 = vector.broadcast %21 : vector<1x128xf32> to vector<8x128xf32>
    %24 = arith.mulf %22, %23 : vector<8x128xf32>
    %25 = vector.extract_strided_slice %10 {offsets = [0, 1], sizes = [8, 1], strides = [1, 1]} : vector<8x3xf32> to vector<8x1xf32>
    %26 = vector.extract_strided_slice %12 {offsets = [1, 0], sizes = [1, 128], strides = [1, 1]} : vector<3x128xf32> to vector<1x128xf32>
    %27 = vector.broadcast %25 : vector<8x1xf32> to vector<8x128xf32>
    %28 = vector.broadcast %26 : vector<1x128xf32> to vector<8x128xf32>
    %29 = arith.mulf %27, %28 : vector<8x128xf32>
    %30 = arith.addf %19, %29 : vector<8x128xf32>
    %31 = vector.extract_strided_slice %10 {offsets = [0, 1], sizes = [8, 1], strides = [1, 1]} : vector<8x3xf32> to vector<8x1xf32>
    %32 = vector.extract_strided_slice %14 {offsets = [1, 0], sizes = [1, 128], strides = [1, 1]} : vector<3x128xf32> to vector<1x128xf32>
    %33 = vector.broadcast %31 : vector<8x1xf32> to vector<8x128xf32>
    %34 = vector.broadcast %32 : vector<1x128xf32> to vector<8x128xf32>
    %35 = arith.mulf %33, %34 : vector<8x128xf32>
    %36 = arith.addf %24, %35 : vector<8x128xf32>
    %37 = vector.extract_strided_slice %10 {offsets = [0, 2], sizes = [8, 1], strides = [1, 1]} : vector<8x3xf32> to vector<8x1xf32>
    %38 = vector.extract_strided_slice %12 {offsets = [2, 0], sizes = [1, 128], strides = [1, 1]} : vector<3x128xf32> to vector<1x128xf32>
    %39 = vector.broadcast %37 : vector<8x1xf32> to vector<8x128xf32>
    %40 = vector.broadcast %38 : vector<1x128xf32> to vector<8x128xf32>
    %41 = arith.mulf %39, %40 : vector<8x128xf32>
    %42 = arith.addf %30, %41 : vector<8x128xf32>
    %43 = vector.extract_strided_slice %10 {offsets = [0, 2], sizes = [8, 1], strides = [1, 1]} : vector<8x3xf32> to vector<8x1xf32>
    %44 = vector.extract_strided_slice %14 {offsets = [2, 0], sizes = [1, 128], strides = [1, 1]} : vector<3x128xf32> to vector<1x128xf32>
    %45 = vector.broadcast %43 : vector<8x1xf32> to vector<8x128xf32>
    %46 = vector.broadcast %44 : vector<1x128xf32> to vector<8x128xf32>
    %47 = arith.mulf %45, %46 : vector<8x128xf32>
    %48 = arith.addf %36, %47 : vector<8x128xf32>
    %49 = tpu.concatenate %42, %48 in 0 : vector<8x128xf32>, vector<8x128xf32> -> vector<16x128xf32>
    %50 = tpu.iota {dimensions = array<i32: 1>} : vector<16x128xi32>
    %c16_i32 = arith.constant 16 : i32
    %51 = vector.broadcast %c16_i32 : i32 to vector<16x128xi32>
    %52 = arith.cmpi sge, %50, %51 : vector<16x128xi32>
    %cst_9 = arith.constant 1.000000e+30 : f32
    %53 = vector.broadcast %cst_9 : f32 to vector<16x128xf32>
    %54 = arith.select %52, %53, %49 : vector<16x128xi1>, vector<16x128xf32>
    %c127_i32 = arith.constant 127 : i32
    %55 = tpu.dynamic_rotate %54 by %c127_i32 dim 1 : vector<16x128xf32>, i32 -> vector<16x128xf32>
    %c1_i32 = arith.constant 1 : i32
    %56 = tpu.dynamic_rotate %54 by %c1_i32 dim 1 : vector<16x128xf32>, i32 -> vector<16x128xf32>
    %c1_i32_10 = arith.constant 1 : i32
    %57 = vector.broadcast %c1_i32_10 : i32 to vector<16x128xi32>
    %58 = arith.andi %50, %57 : vector<16x128xi32>
    %c0_i32_11 = arith.constant 0 : i32
    %59 = vector.broadcast %c0_i32_11 : i32 to vector<16x128xi32>
    %60 = arith.cmpi eq, %58, %59 : vector<16x128xi32>
    %61 = arith.select %60, %55, %56 : vector<16x128xi1>, vector<16x128xf32>
    %c2_i32 = arith.constant 2 : i32
    %62 = vector.broadcast %c2_i32 : i32 to vector<16x128xi32>
    %63 = arith.andi %50, %62 : vector<16x128xi32>
    %c0_i32_12 = arith.constant 0 : i32
    %64 = vector.broadcast %c0_i32_12 : i32 to vector<16x128xi32>
    %65 = arith.cmpi eq, %63, %64 : vector<16x128xi32>
    %66 = arith.xori %60, %65 : vector<16x128xi1>
    %cst_13 = arith.constant dense<true> : vector<16x128xi1>
    %67 = arith.xori %66, %cst_13 : vector<16x128xi1>
    %68 = arith.minimumf %54, %61 : vector<16x128xf32>
    %69 = arith.maximumf %54, %61 : vector<16x128xf32>
    %70 = arith.select %67, %68, %69 : vector<16x128xi1>, vector<16x128xf32>
    %c126_i32 = arith.constant 126 : i32
    %71 = tpu.dynamic_rotate %70 by %c126_i32 dim 1 : vector<16x128xf32>, i32 -> vector<16x128xf32>
    %c2_i32_14 = arith.constant 2 : i32
    %72 = tpu.dynamic_rotate %70 by %c2_i32_14 dim 1 : vector<16x128xf32>, i32 -> vector<16x128xf32>
    %c2_i32_15 = arith.constant 2 : i32
    %73 = vector.broadcast %c2_i32_15 : i32 to vector<16x128xi32>
    %74 = arith.andi %50, %73 : vector<16x128xi32>
    %c0_i32_16 = arith.constant 0 : i32
    %75 = vector.broadcast %c0_i32_16 : i32 to vector<16x128xi32>
    %76 = arith.cmpi eq, %74, %75 : vector<16x128xi32>
    %77 = arith.select %76, %71, %72 : vector<16x128xi1>, vector<16x128xf32>
    %c4_i32 = arith.constant 4 : i32
    %78 = vector.broadcast %c4_i32 : i32 to vector<16x128xi32>
    %79 = arith.andi %50, %78 : vector<16x128xi32>
    %c0_i32_17 = arith.constant 0 : i32
    %80 = vector.broadcast %c0_i32_17 : i32 to vector<16x128xi32>
    %81 = arith.cmpi eq, %79, %80 : vector<16x128xi32>
    %82 = arith.xori %76, %81 : vector<16x128xi1>
    %cst_18 = arith.constant dense<true> : vector<16x128xi1>
    %83 = arith.xori %82, %cst_18 : vector<16x128xi1>
    %84 = arith.minimumf %70, %77 : vector<16x128xf32>
    %85 = arith.maximumf %70, %77 : vector<16x128xf32>
    %86 = arith.select %83, %84, %85 : vector<16x128xi1>, vector<16x128xf32>
    %c127_i32_19 = arith.constant 127 : i32
    %87 = tpu.dynamic_rotate %86 by %c127_i32_19 dim 1 : vector<16x128xf32>, i32 -> vector<16x128xf32>
    %c1_i32_20 = arith.constant 1 : i32
    %88 = tpu.dynamic_rotate %86 by %c1_i32_20 dim 1 : vector<16x128xf32>, i32 -> vector<16x128xf32>
    %c1_i32_21 = arith.constant 1 : i32
    %89 = vector.broadcast %c1_i32_21 : i32 to vector<16x128xi32>
    %90 = arith.andi %50, %89 : vector<16x128xi32>
    %c0_i32_22 = arith.constant 0 : i32
    %91 = vector.broadcast %c0_i32_22 : i32 to vector<16x128xi32>
    %92 = arith.cmpi eq, %90, %91 : vector<16x128xi32>
    %93 = arith.select %92, %87, %88 : vector<16x128xi1>, vector<16x128xf32>
    %c4_i32_23 = arith.constant 4 : i32
    %94 = vector.broadcast %c4_i32_23 : i32 to vector<16x128xi32>
    %95 = arith.andi %50, %94 : vector<16x128xi32>
    %c0_i32_24 = arith.constant 0 : i32
    %96 = vector.broadcast %c0_i32_24 : i32 to vector<16x128xi32>
    %97 = arith.cmpi eq, %95, %96 : vector<16x128xi32>
    %98 = arith.xori %92, %97 : vector<16x128xi1>
    %cst_25 = arith.constant dense<true> : vector<16x128xi1>
    %99 = arith.xori %98, %cst_25 : vector<16x128xi1>
    %100 = arith.minimumf %86, %93 : vector<16x128xf32>
    %101 = arith.maximumf %86, %93 : vector<16x128xf32>
    %102 = arith.select %99, %100, %101 : vector<16x128xi1>, vector<16x128xf32>
    %c124_i32 = arith.constant 124 : i32
    %103 = tpu.dynamic_rotate %102 by %c124_i32 dim 1 : vector<16x128xf32>, i32 -> vector<16x128xf32>
    %c4_i32_26 = arith.constant 4 : i32
    %104 = tpu.dynamic_rotate %102 by %c4_i32_26 dim 1 : vector<16x128xf32>, i32 -> vector<16x128xf32>
    %c4_i32_27 = arith.constant 4 : i32
    %105 = vector.broadcast %c4_i32_27 : i32 to vector<16x128xi32>
    %106 = arith.andi %50, %105 : vector<16x128xi32>
    %c0_i32_28 = arith.constant 0 : i32
    %107 = vector.broadcast %c0_i32_28 : i32 to vector<16x128xi32>
    %108 = arith.cmpi eq, %106, %107 : vector<16x128xi32>
    %109 = arith.select %108, %103, %104 : vector<16x128xi1>, vector<16x128xf32>
    %c8_i32 = arith.constant 8 : i32
    %110 = vector.broadcast %c8_i32 : i32 to vector<16x128xi32>
    %111 = arith.andi %50, %110 : vector<16x128xi32>
    %c0_i32_29 = arith.constant 0 : i32
    %112 = vector.broadcast %c0_i32_29 : i32 to vector<16x128xi32>
    %113 = arith.cmpi eq, %111, %112 : vector<16x128xi32>
    %114 = arith.xori %108, %113 : vector<16x128xi1>
    %cst_30 = arith.constant dense<true> : vector<16x128xi1>
    %115 = arith.xori %114, %cst_30 : vector<16x128xi1>
    %116 = arith.minimumf %102, %109 : vector<16x128xf32>
    %117 = arith.maximumf %102, %109 : vector<16x128xf32>
    %118 = arith.select %115, %116, %117 : vector<16x128xi1>, vector<16x128xf32>
    %c126_i32_31 = arith.constant 126 : i32
    %119 = tpu.dynamic_rotate %118 by %c126_i32_31 dim 1 : vector<16x128xf32>, i32 -> vector<16x128xf32>
    %c2_i32_32 = arith.constant 2 : i32
    %120 = tpu.dynamic_rotate %118 by %c2_i32_32 dim 1 : vector<16x128xf32>, i32 -> vector<16x128xf32>
    %c2_i32_33 = arith.constant 2 : i32
    %121 = vector.broadcast %c2_i32_33 : i32 to vector<16x128xi32>
    %122 = arith.andi %50, %121 : vector<16x128xi32>
    %c0_i32_34 = arith.constant 0 : i32
    %123 = vector.broadcast %c0_i32_34 : i32 to vector<16x128xi32>
    %124 = arith.cmpi eq, %122, %123 : vector<16x128xi32>
    %125 = arith.select %124, %119, %120 : vector<16x128xi1>, vector<16x128xf32>
    %c8_i32_35 = arith.constant 8 : i32
    %126 = vector.broadcast %c8_i32_35 : i32 to vector<16x128xi32>
    %127 = arith.andi %50, %126 : vector<16x128xi32>
    %c0_i32_36 = arith.constant 0 : i32
    %128 = vector.broadcast %c0_i32_36 : i32 to vector<16x128xi32>
    %129 = arith.cmpi eq, %127, %128 : vector<16x128xi32>
    %130 = arith.xori %124, %129 : vector<16x128xi1>
    %cst_37 = arith.constant dense<true> : vector<16x128xi1>
    %131 = arith.xori %130, %cst_37 : vector<16x128xi1>
    %132 = arith.minimumf %118, %125 : vector<16x128xf32>
    %133 = arith.maximumf %118, %125 : vector<16x128xf32>
    %134 = arith.select %131, %132, %133 : vector<16x128xi1>, vector<16x128xf32>
    %c127_i32_38 = arith.constant 127 : i32
    %135 = tpu.dynamic_rotate %134 by %c127_i32_38 dim 1 : vector<16x128xf32>, i32 -> vector<16x128xf32>
    %c1_i32_39 = arith.constant 1 : i32
    %136 = tpu.dynamic_rotate %134 by %c1_i32_39 dim 1 : vector<16x128xf32>, i32 -> vector<16x128xf32>
    %c1_i32_40 = arith.constant 1 : i32
    %137 = vector.broadcast %c1_i32_40 : i32 to vector<16x128xi32>
    %138 = arith.andi %50, %137 : vector<16x128xi32>
    %c0_i32_41 = arith.constant 0 : i32
    %139 = vector.broadcast %c0_i32_41 : i32 to vector<16x128xi32>
    %140 = arith.cmpi eq, %138, %139 : vector<16x128xi32>
    %141 = arith.select %140, %135, %136 : vector<16x128xi1>, vector<16x128xf32>
    %c8_i32_42 = arith.constant 8 : i32
    %142 = vector.broadcast %c8_i32_42 : i32 to vector<16x128xi32>
    %143 = arith.andi %50, %142 : vector<16x128xi32>
    %c0_i32_43 = arith.constant 0 : i32
    %144 = vector.broadcast %c0_i32_43 : i32 to vector<16x128xi32>
    %145 = arith.cmpi eq, %143, %144 : vector<16x128xi32>
    %146 = arith.xori %140, %145 : vector<16x128xi1>
    %cst_44 = arith.constant dense<true> : vector<16x128xi1>
    %147 = arith.xori %146, %cst_44 : vector<16x128xi1>
    %148 = arith.minimumf %134, %141 : vector<16x128xf32>
    %149 = arith.maximumf %134, %141 : vector<16x128xf32>
    %150 = arith.select %147, %148, %149 : vector<16x128xi1>, vector<16x128xf32>
    %c120_i32 = arith.constant 120 : i32
    %151 = tpu.dynamic_rotate %150 by %c120_i32 dim 1 : vector<16x128xf32>, i32 -> vector<16x128xf32>
    %c8_i32_45 = arith.constant 8 : i32
    %152 = tpu.dynamic_rotate %150 by %c8_i32_45 dim 1 : vector<16x128xf32>, i32 -> vector<16x128xf32>
    %c8_i32_46 = arith.constant 8 : i32
    %153 = vector.broadcast %c8_i32_46 : i32 to vector<16x128xi32>
    %154 = arith.andi %50, %153 : vector<16x128xi32>
    %c0_i32_47 = arith.constant 0 : i32
    %155 = vector.broadcast %c0_i32_47 : i32 to vector<16x128xi32>
    %156 = arith.cmpi eq, %154, %155 : vector<16x128xi32>
    %157 = arith.select %156, %151, %152 : vector<16x128xi1>, vector<16x128xf32>
    %c16_i32_48 = arith.constant 16 : i32
    %158 = vector.broadcast %c16_i32_48 : i32 to vector<16x128xi32>
    %159 = arith.andi %50, %158 : vector<16x128xi32>
    %c0_i32_49 = arith.constant 0 : i32
    %160 = vector.broadcast %c0_i32_49 : i32 to vector<16x128xi32>
    %161 = arith.cmpi eq, %159, %160 : vector<16x128xi32>
    %162 = arith.xori %156, %161 : vector<16x128xi1>
    %cst_50 = arith.constant dense<true> : vector<16x128xi1>
    %163 = arith.xori %162, %cst_50 : vector<16x128xi1>
    %164 = arith.minimumf %150, %157 : vector<16x128xf32>
    %165 = arith.maximumf %150, %157 : vector<16x128xf32>
    %166 = arith.select %163, %164, %165 : vector<16x128xi1>, vector<16x128xf32>
    %c124_i32_51 = arith.constant 124 : i32
    %167 = tpu.dynamic_rotate %166 by %c124_i32_51 dim 1 : vector<16x128xf32>, i32 -> vector<16x128xf32>
    %c4_i32_52 = arith.constant 4 : i32
    %168 = tpu.dynamic_rotate %166 by %c4_i32_52 dim 1 : vector<16x128xf32>, i32 -> vector<16x128xf32>
    %c4_i32_53 = arith.constant 4 : i32
    %169 = vector.broadcast %c4_i32_53 : i32 to vector<16x128xi32>
    %170 = arith.andi %50, %169 : vector<16x128xi32>
    %c0_i32_54 = arith.constant 0 : i32
    %171 = vector.broadcast %c0_i32_54 : i32 to vector<16x128xi32>
    %172 = arith.cmpi eq, %170, %171 : vector<16x128xi32>
    %173 = arith.select %172, %167, %168 : vector<16x128xi1>, vector<16x128xf32>
    %c16_i32_55 = arith.constant 16 : i32
    %174 = vector.broadcast %c16_i32_55 : i32 to vector<16x128xi32>
    %175 = arith.andi %50, %174 : vector<16x128xi32>
    %c0_i32_56 = arith.constant 0 : i32
    %176 = vector.broadcast %c0_i32_56 : i32 to vector<16x128xi32>
    %177 = arith.cmpi eq, %175, %176 : vector<16x128xi32>
    %178 = arith.xori %172, %177 : vector<16x128xi1>
    %cst_57 = arith.constant dense<true> : vector<16x128xi1>
    %179 = arith.xori %178, %cst_57 : vector<16x128xi1>
    %180 = arith.minimumf %166, %173 : vector<16x128xf32>
    %181 = arith.maximumf %166, %173 : vector<16x128xf32>
    %182 = arith.select %179, %180, %181 : vector<16x128xi1>, vector<16x128xf32>
    %c126_i32_58 = arith.constant 126 : i32
    %183 = tpu.dynamic_rotate %182 by %c126_i32_58 dim 1 : vector<16x128xf32>, i32 -> vector<16x128xf32>
    %c2_i32_59 = arith.constant 2 : i32
    %184 = tpu.dynamic_rotate %182 by %c2_i32_59 dim 1 : vector<16x128xf32>, i32 -> vector<16x128xf32>
    %c2_i32_60 = arith.constant 2 : i32
    %185 = vector.broadcast %c2_i32_60 : i32 to vector<16x128xi32>
    %186 = arith.andi %50, %185 : vector<16x128xi32>
    %c0_i32_61 = arith.constant 0 : i32
    %187 = vector.broadcast %c0_i32_61 : i32 to vector<16x128xi32>
    %188 = arith.cmpi eq, %186, %187 : vector<16x128xi32>
    %189 = arith.select %188, %183, %184 : vector<16x128xi1>, vector<16x128xf32>
    %c16_i32_62 = arith.constant 16 : i32
    %190 = vector.broadcast %c16_i32_62 : i32 to vector<16x128xi32>
    %191 = arith.andi %50, %190 : vector<16x128xi32>
    %c0_i32_63 = arith.constant 0 : i32
    %192 = vector.broadcast %c0_i32_63 : i32 to vector<16x128xi32>
    %193 = arith.cmpi eq, %191, %192 : vector<16x128xi32>
    %194 = arith.xori %188, %193 : vector<16x128xi1>
    %cst_64 = arith.constant dense<true> : vector<16x128xi1>
    %195 = arith.xori %194, %cst_64 : vector<16x128xi1>
    %196 = arith.minimumf %182, %189 : vector<16x128xf32>
    %197 = arith.maximumf %182, %189 : vector<16x128xf32>
    %198 = arith.select %195, %196, %197 : vector<16x128xi1>, vector<16x128xf32>
    %c127_i32_65 = arith.constant 127 : i32
    %199 = tpu.dynamic_rotate %198 by %c127_i32_65 dim 1 : vector<16x128xf32>, i32 -> vector<16x128xf32>
    %c1_i32_66 = arith.constant 1 : i32
    %200 = tpu.dynamic_rotate %198 by %c1_i32_66 dim 1 : vector<16x128xf32>, i32 -> vector<16x128xf32>
    %c1_i32_67 = arith.constant 1 : i32
    %201 = vector.broadcast %c1_i32_67 : i32 to vector<16x128xi32>
    %202 = arith.andi %50, %201 : vector<16x128xi32>
    %c0_i32_68 = arith.constant 0 : i32
    %203 = vector.broadcast %c0_i32_68 : i32 to vector<16x128xi32>
    %204 = arith.cmpi eq, %202, %203 : vector<16x128xi32>
    %205 = arith.select %204, %199, %200 : vector<16x128xi1>, vector<16x128xf32>
    %c16_i32_69 = arith.constant 16 : i32
    %206 = vector.broadcast %c16_i32_69 : i32 to vector<16x128xi32>
    %207 = arith.andi %50, %206 : vector<16x128xi32>
    %c0_i32_70 = arith.constant 0 : i32
    %208 = vector.broadcast %c0_i32_70 : i32 to vector<16x128xi32>
    %209 = arith.cmpi eq, %207, %208 : vector<16x128xi32>
    %210 = arith.xori %204, %209 : vector<16x128xi1>
    %cst_71 = arith.constant dense<true> : vector<16x128xi1>
    %211 = arith.xori %210, %cst_71 : vector<16x128xi1>
    %212 = arith.minimumf %198, %205 : vector<16x128xf32>
    %213 = arith.maximumf %198, %205 : vector<16x128xf32>
    %214 = arith.select %211, %212, %213 : vector<16x128xi1>, vector<16x128xf32>
    %c112_i32 = arith.constant 112 : i32
    %215 = tpu.dynamic_rotate %214 by %c112_i32 dim 1 : vector<16x128xf32>, i32 -> vector<16x128xf32>
    %c16_i32_72 = arith.constant 16 : i32
    %216 = tpu.dynamic_rotate %214 by %c16_i32_72 dim 1 : vector<16x128xf32>, i32 -> vector<16x128xf32>
    %c16_i32_73 = arith.constant 16 : i32
    %217 = vector.broadcast %c16_i32_73 : i32 to vector<16x128xi32>
    %218 = arith.andi %50, %217 : vector<16x128xi32>
    %c0_i32_74 = arith.constant 0 : i32
    %219 = vector.broadcast %c0_i32_74 : i32 to vector<16x128xi32>
    %220 = arith.cmpi eq, %218, %219 : vector<16x128xi32>
    %221 = arith.select %220, %215, %216 : vector<16x128xi1>, vector<16x128xf32>
    %c32_i32 = arith.constant 32 : i32
    %222 = vector.broadcast %c32_i32 : i32 to vector<16x128xi32>
    %223 = arith.andi %50, %222 : vector<16x128xi32>
    %c0_i32_75 = arith.constant 0 : i32
    %224 = vector.broadcast %c0_i32_75 : i32 to vector<16x128xi32>
    %225 = arith.cmpi eq, %223, %224 : vector<16x128xi32>
    %226 = arith.xori %220, %225 : vector<16x128xi1>
    %cst_76 = arith.constant dense<true> : vector<16x128xi1>
    %227 = arith.xori %226, %cst_76 : vector<16x128xi1>
    %228 = arith.minimumf %214, %221 : vector<16x128xf32>
    %229 = arith.maximumf %214, %221 : vector<16x128xf32>
    %230 = arith.select %227, %228, %229 : vector<16x128xi1>, vector<16x128xf32>
    %c120_i32_77 = arith.constant 120 : i32
    %231 = tpu.dynamic_rotate %230 by %c120_i32_77 dim 1 : vector<16x128xf32>, i32 -> vector<16x128xf32>
    %c8_i32_78 = arith.constant 8 : i32
    %232 = tpu.dynamic_rotate %230 by %c8_i32_78 dim 1 : vector<16x128xf32>, i32 -> vector<16x128xf32>
    %c8_i32_79 = arith.constant 8 : i32
    %233 = vector.broadcast %c8_i32_79 : i32 to vector<16x128xi32>
    %234 = arith.andi %50, %233 : vector<16x128xi32>
    %c0_i32_80 = arith.constant 0 : i32
    %235 = vector.broadcast %c0_i32_80 : i32 to vector<16x128xi32>
    %236 = arith.cmpi eq, %234, %235 : vector<16x128xi32>
    %237 = arith.select %236, %231, %232 : vector<16x128xi1>, vector<16x128xf32>
    %c32_i32_81 = arith.constant 32 : i32
    %238 = vector.broadcast %c32_i32_81 : i32 to vector<16x128xi32>
    %239 = arith.andi %50, %238 : vector<16x128xi32>
    %c0_i32_82 = arith.constant 0 : i32
    %240 = vector.broadcast %c0_i32_82 : i32 to vector<16x128xi32>
    %241 = arith.cmpi eq, %239, %240 : vector<16x128xi32>
    %242 = arith.xori %236, %241 : vector<16x128xi1>
    %cst_83 = arith.constant dense<true> : vector<16x128xi1>
    %243 = arith.xori %242, %cst_83 : vector<16x128xi1>
    %244 = arith.minimumf %230, %237 : vector<16x128xf32>
    %245 = arith.maximumf %230, %237 : vector<16x128xf32>
    %246 = arith.select %243, %244, %245 : vector<16x128xi1>, vector<16x128xf32>
    %c124_i32_84 = arith.constant 124 : i32
    %247 = tpu.dynamic_rotate %246 by %c124_i32_84 dim 1 : vector<16x128xf32>, i32 -> vector<16x128xf32>
    %c4_i32_85 = arith.constant 4 : i32
    %248 = tpu.dynamic_rotate %246 by %c4_i32_85 dim 1 : vector<16x128xf32>, i32 -> vector<16x128xf32>
    %c4_i32_86 = arith.constant 4 : i32
    %249 = vector.broadcast %c4_i32_86 : i32 to vector<16x128xi32>
    %250 = arith.andi %50, %249 : vector<16x128xi32>
    %c0_i32_87 = arith.constant 0 : i32
    %251 = vector.broadcast %c0_i32_87 : i32 to vector<16x128xi32>
    %252 = arith.cmpi eq, %250, %251 : vector<16x128xi32>
    %253 = arith.select %252, %247, %248 : vector<16x128xi1>, vector<16x128xf32>
    %c32_i32_88 = arith.constant 32 : i32
    %254 = vector.broadcast %c32_i32_88 : i32 to vector<16x128xi32>
    %255 = arith.andi %50, %254 : vector<16x128xi32>
    %c0_i32_89 = arith.constant 0 : i32
    %256 = vector.broadcast %c0_i32_89 : i32 to vector<16x128xi32>
    %257 = arith.cmpi eq, %255, %256 : vector<16x128xi32>
    %258 = arith.xori %252, %257 : vector<16x128xi1>
    %cst_90 = arith.constant dense<true> : vector<16x128xi1>
    %259 = arith.xori %258, %cst_90 : vector<16x128xi1>
    %260 = arith.minimumf %246, %253 : vector<16x128xf32>
    %261 = arith.maximumf %246, %253 : vector<16x128xf32>
    %262 = arith.select %259, %260, %261 : vector<16x128xi1>, vector<16x128xf32>
    %c126_i32_91 = arith.constant 126 : i32
    %263 = tpu.dynamic_rotate %262 by %c126_i32_91 dim 1 : vector<16x128xf32>, i32 -> vector<16x128xf32>
    %c2_i32_92 = arith.constant 2 : i32
    %264 = tpu.dynamic_rotate %262 by %c2_i32_92 dim 1 : vector<16x128xf32>, i32 -> vector<16x128xf32>
    %c2_i32_93 = arith.constant 2 : i32
    %265 = vector.broadcast %c2_i32_93 : i32 to vector<16x128xi32>
    %266 = arith.andi %50, %265 : vector<16x128xi32>
    %c0_i32_94 = arith.constant 0 : i32
    %267 = vector.broadcast %c0_i32_94 : i32 to vector<16x128xi32>
    %268 = arith.cmpi eq, %266, %267 : vector<16x128xi32>
    %269 = arith.select %268, %263, %264 : vector<16x128xi1>, vector<16x128xf32>
    %c32_i32_95 = arith.constant 32 : i32
    %270 = vector.broadcast %c32_i32_95 : i32 to vector<16x128xi32>
    %271 = arith.andi %50, %270 : vector<16x128xi32>
    %c0_i32_96 = arith.constant 0 : i32
    %272 = vector.broadcast %c0_i32_96 : i32 to vector<16x128xi32>
    %273 = arith.cmpi eq, %271, %272 : vector<16x128xi32>
    %274 = arith.xori %268, %273 : vector<16x128xi1>
    %cst_97 = arith.constant dense<true> : vector<16x128xi1>
    %275 = arith.xori %274, %cst_97 : vector<16x128xi1>
    %276 = arith.minimumf %262, %269 : vector<16x128xf32>
    %277 = arith.maximumf %262, %269 : vector<16x128xf32>
    %278 = arith.select %275, %276, %277 : vector<16x128xi1>, vector<16x128xf32>
    %c127_i32_98 = arith.constant 127 : i32
    %279 = tpu.dynamic_rotate %278 by %c127_i32_98 dim 1 : vector<16x128xf32>, i32 -> vector<16x128xf32>
    %c1_i32_99 = arith.constant 1 : i32
    %280 = tpu.dynamic_rotate %278 by %c1_i32_99 dim 1 : vector<16x128xf32>, i32 -> vector<16x128xf32>
    %c1_i32_100 = arith.constant 1 : i32
    %281 = vector.broadcast %c1_i32_100 : i32 to vector<16x128xi32>
    %282 = arith.andi %50, %281 : vector<16x128xi32>
    %c0_i32_101 = arith.constant 0 : i32
    %283 = vector.broadcast %c0_i32_101 : i32 to vector<16x128xi32>
    %284 = arith.cmpi eq, %282, %283 : vector<16x128xi32>
    %285 = arith.select %284, %279, %280 : vector<16x128xi1>, vector<16x128xf32>
    %c32_i32_102 = arith.constant 32 : i32
    %286 = vector.broadcast %c32_i32_102 : i32 to vector<16x128xi32>
    %287 = arith.andi %50, %286 : vector<16x128xi32>
    %c0_i32_103 = arith.constant 0 : i32
    %288 = vector.broadcast %c0_i32_103 : i32 to vector<16x128xi32>
    %289 = arith.cmpi eq, %287, %288 : vector<16x128xi32>
    %290 = arith.xori %284, %289 : vector<16x128xi1>
    %cst_104 = arith.constant dense<true> : vector<16x128xi1>
    %291 = arith.xori %290, %cst_104 : vector<16x128xi1>
    %292 = arith.minimumf %278, %285 : vector<16x128xf32>
    %293 = arith.maximumf %278, %285 : vector<16x128xf32>
    %294 = arith.select %291, %292, %293 : vector<16x128xi1>, vector<16x128xf32>
    %c96_i32 = arith.constant 96 : i32
    %295 = tpu.dynamic_rotate %294 by %c96_i32 dim 1 : vector<16x128xf32>, i32 -> vector<16x128xf32>
    %c32_i32_105 = arith.constant 32 : i32
    %296 = tpu.dynamic_rotate %294 by %c32_i32_105 dim 1 : vector<16x128xf32>, i32 -> vector<16x128xf32>
    %c32_i32_106 = arith.constant 32 : i32
    %297 = vector.broadcast %c32_i32_106 : i32 to vector<16x128xi32>
    %298 = arith.andi %50, %297 : vector<16x128xi32>
    %c0_i32_107 = arith.constant 0 : i32
    %299 = vector.broadcast %c0_i32_107 : i32 to vector<16x128xi32>
    %300 = arith.cmpi eq, %298, %299 : vector<16x128xi32>
    %301 = arith.select %300, %295, %296 : vector<16x128xi1>, vector<16x128xf32>
    %c64_i32 = arith.constant 64 : i32
    %302 = vector.broadcast %c64_i32 : i32 to vector<16x128xi32>
    %303 = arith.andi %50, %302 : vector<16x128xi32>
    %c0_i32_108 = arith.constant 0 : i32
    %304 = vector.broadcast %c0_i32_108 : i32 to vector<16x128xi32>
    %305 = arith.cmpi eq, %303, %304 : vector<16x128xi32>
    %306 = arith.xori %300, %305 : vector<16x128xi1>
    %cst_109 = arith.constant dense<true> : vector<16x128xi1>
    %307 = arith.xori %306, %cst_109 : vector<16x128xi1>
    %308 = arith.minimumf %294, %301 : vector<16x128xf32>
    %309 = arith.maximumf %294, %301 : vector<16x128xf32>
    %310 = arith.select %307, %308, %309 : vector<16x128xi1>, vector<16x128xf32>
    %c112_i32_110 = arith.constant 112 : i32
    %311 = tpu.dynamic_rotate %310 by %c112_i32_110 dim 1 : vector<16x128xf32>, i32 -> vector<16x128xf32>
    %c16_i32_111 = arith.constant 16 : i32
    %312 = tpu.dynamic_rotate %310 by %c16_i32_111 dim 1 : vector<16x128xf32>, i32 -> vector<16x128xf32>
    %c16_i32_112 = arith.constant 16 : i32
    %313 = vector.broadcast %c16_i32_112 : i32 to vector<16x128xi32>
    %314 = arith.andi %50, %313 : vector<16x128xi32>
    %c0_i32_113 = arith.constant 0 : i32
    %315 = vector.broadcast %c0_i32_113 : i32 to vector<16x128xi32>
    %316 = arith.cmpi eq, %314, %315 : vector<16x128xi32>
    %317 = arith.select %316, %311, %312 : vector<16x128xi1>, vector<16x128xf32>
    %c64_i32_114 = arith.constant 64 : i32
    %318 = vector.broadcast %c64_i32_114 : i32 to vector<16x128xi32>
    %319 = arith.andi %50, %318 : vector<16x128xi32>
    %c0_i32_115 = arith.constant 0 : i32
    %320 = vector.broadcast %c0_i32_115 : i32 to vector<16x128xi32>
    %321 = arith.cmpi eq, %319, %320 : vector<16x128xi32>
    %322 = arith.xori %316, %321 : vector<16x128xi1>
    %cst_116 = arith.constant dense<true> : vector<16x128xi1>
    %323 = arith.xori %322, %cst_116 : vector<16x128xi1>
    %324 = arith.minimumf %310, %317 : vector<16x128xf32>
    %325 = arith.maximumf %310, %317 : vector<16x128xf32>
    %326 = arith.select %323, %324, %325 : vector<16x128xi1>, vector<16x128xf32>
    %c120_i32_117 = arith.constant 120 : i32
    %327 = tpu.dynamic_rotate %326 by %c120_i32_117 dim 1 : vector<16x128xf32>, i32 -> vector<16x128xf32>
    %c8_i32_118 = arith.constant 8 : i32
    %328 = tpu.dynamic_rotate %326 by %c8_i32_118 dim 1 : vector<16x128xf32>, i32 -> vector<16x128xf32>
    %c8_i32_119 = arith.constant 8 : i32
    %329 = vector.broadcast %c8_i32_119 : i32 to vector<16x128xi32>
    %330 = arith.andi %50, %329 : vector<16x128xi32>
    %c0_i32_120 = arith.constant 0 : i32
    %331 = vector.broadcast %c0_i32_120 : i32 to vector<16x128xi32>
    %332 = arith.cmpi eq, %330, %331 : vector<16x128xi32>
    %333 = arith.select %332, %327, %328 : vector<16x128xi1>, vector<16x128xf32>
    %c64_i32_121 = arith.constant 64 : i32
    %334 = vector.broadcast %c64_i32_121 : i32 to vector<16x128xi32>
    %335 = arith.andi %50, %334 : vector<16x128xi32>
    %c0_i32_122 = arith.constant 0 : i32
    %336 = vector.broadcast %c0_i32_122 : i32 to vector<16x128xi32>
    %337 = arith.cmpi eq, %335, %336 : vector<16x128xi32>
    %338 = arith.xori %332, %337 : vector<16x128xi1>
    %cst_123 = arith.constant dense<true> : vector<16x128xi1>
    %339 = arith.xori %338, %cst_123 : vector<16x128xi1>
    %340 = arith.minimumf %326, %333 : vector<16x128xf32>
    %341 = arith.maximumf %326, %333 : vector<16x128xf32>
    %342 = arith.select %339, %340, %341 : vector<16x128xi1>, vector<16x128xf32>
    %c124_i32_124 = arith.constant 124 : i32
    %343 = tpu.dynamic_rotate %342 by %c124_i32_124 dim 1 : vector<16x128xf32>, i32 -> vector<16x128xf32>
    %c4_i32_125 = arith.constant 4 : i32
    %344 = tpu.dynamic_rotate %342 by %c4_i32_125 dim 1 : vector<16x128xf32>, i32 -> vector<16x128xf32>
    %c4_i32_126 = arith.constant 4 : i32
    %345 = vector.broadcast %c4_i32_126 : i32 to vector<16x128xi32>
    %346 = arith.andi %50, %345 : vector<16x128xi32>
    %c0_i32_127 = arith.constant 0 : i32
    %347 = vector.broadcast %c0_i32_127 : i32 to vector<16x128xi32>
    %348 = arith.cmpi eq, %346, %347 : vector<16x128xi32>
    %349 = arith.select %348, %343, %344 : vector<16x128xi1>, vector<16x128xf32>
    %c64_i32_128 = arith.constant 64 : i32
    %350 = vector.broadcast %c64_i32_128 : i32 to vector<16x128xi32>
    %351 = arith.andi %50, %350 : vector<16x128xi32>
    %c0_i32_129 = arith.constant 0 : i32
    %352 = vector.broadcast %c0_i32_129 : i32 to vector<16x128xi32>
    %353 = arith.cmpi eq, %351, %352 : vector<16x128xi32>
    %354 = arith.xori %348, %353 : vector<16x128xi1>
    %cst_130 = arith.constant dense<true> : vector<16x128xi1>
    %355 = arith.xori %354, %cst_130 : vector<16x128xi1>
    %356 = arith.minimumf %342, %349 : vector<16x128xf32>
    %357 = arith.maximumf %342, %349 : vector<16x128xf32>
    %358 = arith.select %355, %356, %357 : vector<16x128xi1>, vector<16x128xf32>
    %c126_i32_131 = arith.constant 126 : i32
    %359 = tpu.dynamic_rotate %358 by %c126_i32_131 dim 1 : vector<16x128xf32>, i32 -> vector<16x128xf32>
    %c2_i32_132 = arith.constant 2 : i32
    %360 = tpu.dynamic_rotate %358 by %c2_i32_132 dim 1 : vector<16x128xf32>, i32 -> vector<16x128xf32>
    %c2_i32_133 = arith.constant 2 : i32
    %361 = vector.broadcast %c2_i32_133 : i32 to vector<16x128xi32>
    %362 = arith.andi %50, %361 : vector<16x128xi32>
    %c0_i32_134 = arith.constant 0 : i32
    %363 = vector.broadcast %c0_i32_134 : i32 to vector<16x128xi32>
    %364 = arith.cmpi eq, %362, %363 : vector<16x128xi32>
    %365 = arith.select %364, %359, %360 : vector<16x128xi1>, vector<16x128xf32>
    %c64_i32_135 = arith.constant 64 : i32
    %366 = vector.broadcast %c64_i32_135 : i32 to vector<16x128xi32>
    %367 = arith.andi %50, %366 : vector<16x128xi32>
    %c0_i32_136 = arith.constant 0 : i32
    %368 = vector.broadcast %c0_i32_136 : i32 to vector<16x128xi32>
    %369 = arith.cmpi eq, %367, %368 : vector<16x128xi32>
    %370 = arith.xori %364, %369 : vector<16x128xi1>
    %cst_137 = arith.constant dense<true> : vector<16x128xi1>
    %371 = arith.xori %370, %cst_137 : vector<16x128xi1>
    %372 = arith.minimumf %358, %365 : vector<16x128xf32>
    %373 = arith.maximumf %358, %365 : vector<16x128xf32>
    %374 = arith.select %371, %372, %373 : vector<16x128xi1>, vector<16x128xf32>
    %c127_i32_138 = arith.constant 127 : i32
    %375 = tpu.dynamic_rotate %374 by %c127_i32_138 dim 1 : vector<16x128xf32>, i32 -> vector<16x128xf32>
    %c1_i32_139 = arith.constant 1 : i32
    %376 = tpu.dynamic_rotate %374 by %c1_i32_139 dim 1 : vector<16x128xf32>, i32 -> vector<16x128xf32>
    %c1_i32_140 = arith.constant 1 : i32
    %377 = vector.broadcast %c1_i32_140 : i32 to vector<16x128xi32>
    %378 = arith.andi %50, %377 : vector<16x128xi32>
    %c0_i32_141 = arith.constant 0 : i32
    %379 = vector.broadcast %c0_i32_141 : i32 to vector<16x128xi32>
    %380 = arith.cmpi eq, %378, %379 : vector<16x128xi32>
    %381 = arith.select %380, %375, %376 : vector<16x128xi1>, vector<16x128xf32>
    %c64_i32_142 = arith.constant 64 : i32
    %382 = vector.broadcast %c64_i32_142 : i32 to vector<16x128xi32>
    %383 = arith.andi %50, %382 : vector<16x128xi32>
    %c0_i32_143 = arith.constant 0 : i32
    %384 = vector.broadcast %c0_i32_143 : i32 to vector<16x128xi32>
    %385 = arith.cmpi eq, %383, %384 : vector<16x128xi32>
    %386 = arith.xori %380, %385 : vector<16x128xi1>
    %cst_144 = arith.constant dense<true> : vector<16x128xi1>
    %387 = arith.xori %386, %cst_144 : vector<16x128xi1>
    %388 = arith.minimumf %374, %381 : vector<16x128xf32>
    %389 = arith.maximumf %374, %381 : vector<16x128xf32>
    %390 = arith.select %387, %388, %389 : vector<16x128xi1>, vector<16x128xf32>
    %c64_i32_145 = arith.constant 64 : i32
    %391 = tpu.dynamic_rotate %390 by %c64_i32_145 dim 1 : vector<16x128xf32>, i32 -> vector<16x128xf32>
    %c64_i32_146 = arith.constant 64 : i32
    %392 = tpu.dynamic_rotate %390 by %c64_i32_146 dim 1 : vector<16x128xf32>, i32 -> vector<16x128xf32>
    %c64_i32_147 = arith.constant 64 : i32
    %393 = vector.broadcast %c64_i32_147 : i32 to vector<16x128xi32>
    %394 = arith.andi %50, %393 : vector<16x128xi32>
    %c0_i32_148 = arith.constant 0 : i32
    %395 = vector.broadcast %c0_i32_148 : i32 to vector<16x128xi32>
    %396 = arith.cmpi eq, %394, %395 : vector<16x128xi32>
    %397 = arith.select %396, %391, %392 : vector<16x128xi1>, vector<16x128xf32>
    %398 = arith.minimumf %390, %397 : vector<16x128xf32>
    %399 = arith.maximumf %390, %397 : vector<16x128xf32>
    %400 = arith.select %396, %398, %399 : vector<16x128xi1>, vector<16x128xf32>
    %c96_i32_149 = arith.constant 96 : i32
    %401 = tpu.dynamic_rotate %400 by %c96_i32_149 dim 1 : vector<16x128xf32>, i32 -> vector<16x128xf32>
    %c32_i32_150 = arith.constant 32 : i32
    %402 = tpu.dynamic_rotate %400 by %c32_i32_150 dim 1 : vector<16x128xf32>, i32 -> vector<16x128xf32>
    %c32_i32_151 = arith.constant 32 : i32
    %403 = vector.broadcast %c32_i32_151 : i32 to vector<16x128xi32>
    %404 = arith.andi %50, %403 : vector<16x128xi32>
    %c0_i32_152 = arith.constant 0 : i32
    %405 = vector.broadcast %c0_i32_152 : i32 to vector<16x128xi32>
    %406 = arith.cmpi eq, %404, %405 : vector<16x128xi32>
    %407 = arith.select %406, %401, %402 : vector<16x128xi1>, vector<16x128xf32>
    %408 = arith.minimumf %400, %407 : vector<16x128xf32>
    %409 = arith.maximumf %400, %407 : vector<16x128xf32>
    %410 = arith.select %406, %408, %409 : vector<16x128xi1>, vector<16x128xf32>
    %c112_i32_153 = arith.constant 112 : i32
    %411 = tpu.dynamic_rotate %410 by %c112_i32_153 dim 1 : vector<16x128xf32>, i32 -> vector<16x128xf32>
    %c16_i32_154 = arith.constant 16 : i32
    %412 = tpu.dynamic_rotate %410 by %c16_i32_154 dim 1 : vector<16x128xf32>, i32 -> vector<16x128xf32>
    %c16_i32_155 = arith.constant 16 : i32
    %413 = vector.broadcast %c16_i32_155 : i32 to vector<16x128xi32>
    %414 = arith.andi %50, %413 : vector<16x128xi32>
    %c0_i32_156 = arith.constant 0 : i32
    %415 = vector.broadcast %c0_i32_156 : i32 to vector<16x128xi32>
    %416 = arith.cmpi eq, %414, %415 : vector<16x128xi32>
    %417 = arith.select %416, %411, %412 : vector<16x128xi1>, vector<16x128xf32>
    %418 = arith.minimumf %410, %417 : vector<16x128xf32>
    %419 = arith.maximumf %410, %417 : vector<16x128xf32>
    %420 = arith.select %416, %418, %419 : vector<16x128xi1>, vector<16x128xf32>
    %c120_i32_157 = arith.constant 120 : i32
    %421 = tpu.dynamic_rotate %420 by %c120_i32_157 dim 1 : vector<16x128xf32>, i32 -> vector<16x128xf32>
    %c8_i32_158 = arith.constant 8 : i32
    %422 = tpu.dynamic_rotate %420 by %c8_i32_158 dim 1 : vector<16x128xf32>, i32 -> vector<16x128xf32>
    %c8_i32_159 = arith.constant 8 : i32
    %423 = vector.broadcast %c8_i32_159 : i32 to vector<16x128xi32>
    %424 = arith.andi %50, %423 : vector<16x128xi32>
    %c0_i32_160 = arith.constant 0 : i32
    %425 = vector.broadcast %c0_i32_160 : i32 to vector<16x128xi32>
    %426 = arith.cmpi eq, %424, %425 : vector<16x128xi32>
    %427 = arith.select %426, %421, %422 : vector<16x128xi1>, vector<16x128xf32>
    %428 = arith.minimumf %420, %427 : vector<16x128xf32>
    %429 = arith.maximumf %420, %427 : vector<16x128xf32>
    %430 = arith.select %426, %428, %429 : vector<16x128xi1>, vector<16x128xf32>
    %c124_i32_161 = arith.constant 124 : i32
    %431 = tpu.dynamic_rotate %430 by %c124_i32_161 dim 1 : vector<16x128xf32>, i32 -> vector<16x128xf32>
    %c4_i32_162 = arith.constant 4 : i32
    %432 = tpu.dynamic_rotate %430 by %c4_i32_162 dim 1 : vector<16x128xf32>, i32 -> vector<16x128xf32>
    %c4_i32_163 = arith.constant 4 : i32
    %433 = vector.broadcast %c4_i32_163 : i32 to vector<16x128xi32>
    %434 = arith.andi %50, %433 : vector<16x128xi32>
    %c0_i32_164 = arith.constant 0 : i32
    %435 = vector.broadcast %c0_i32_164 : i32 to vector<16x128xi32>
    %436 = arith.cmpi eq, %434, %435 : vector<16x128xi32>
    %437 = arith.select %436, %431, %432 : vector<16x128xi1>, vector<16x128xf32>
    %438 = arith.minimumf %430, %437 : vector<16x128xf32>
    %439 = arith.maximumf %430, %437 : vector<16x128xf32>
    %440 = arith.select %436, %438, %439 : vector<16x128xi1>, vector<16x128xf32>
    %c126_i32_165 = arith.constant 126 : i32
    %441 = tpu.dynamic_rotate %440 by %c126_i32_165 dim 1 : vector<16x128xf32>, i32 -> vector<16x128xf32>
    %c2_i32_166 = arith.constant 2 : i32
    %442 = tpu.dynamic_rotate %440 by %c2_i32_166 dim 1 : vector<16x128xf32>, i32 -> vector<16x128xf32>
    %c2_i32_167 = arith.constant 2 : i32
    %443 = vector.broadcast %c2_i32_167 : i32 to vector<16x128xi32>
    %444 = arith.andi %50, %443 : vector<16x128xi32>
    %c0_i32_168 = arith.constant 0 : i32
    %445 = vector.broadcast %c0_i32_168 : i32 to vector<16x128xi32>
    %446 = arith.cmpi eq, %444, %445 : vector<16x128xi32>
    %447 = arith.select %446, %441, %442 : vector<16x128xi1>, vector<16x128xf32>
    %448 = arith.minimumf %440, %447 : vector<16x128xf32>
    %449 = arith.maximumf %440, %447 : vector<16x128xf32>
    %450 = arith.select %446, %448, %449 : vector<16x128xi1>, vector<16x128xf32>
    %c127_i32_169 = arith.constant 127 : i32
    %451 = tpu.dynamic_rotate %450 by %c127_i32_169 dim 1 : vector<16x128xf32>, i32 -> vector<16x128xf32>
    %c1_i32_170 = arith.constant 1 : i32
    %452 = tpu.dynamic_rotate %450 by %c1_i32_170 dim 1 : vector<16x128xf32>, i32 -> vector<16x128xf32>
    %c1_i32_171 = arith.constant 1 : i32
    %453 = vector.broadcast %c1_i32_171 : i32 to vector<16x128xi32>
    %454 = arith.andi %50, %453 : vector<16x128xi32>
    %c0_i32_172 = arith.constant 0 : i32
    %455 = vector.broadcast %c0_i32_172 : i32 to vector<16x128xi32>
    %456 = arith.cmpi eq, %454, %455 : vector<16x128xi32>
    %457 = arith.select %456, %451, %452 : vector<16x128xi1>, vector<16x128xf32>
    %458 = arith.minimumf %450, %457 : vector<16x128xf32>
    %459 = arith.maximumf %450, %457 : vector<16x128xf32>
    %460 = arith.select %456, %458, %459 : vector<16x128xi1>, vector<16x128xf32>
    %461 = vector.extract_strided_slice %460 {offsets = [0, 0], sizes = [8, 128], strides = [1, 1]} : vector<16x128xf32> to vector<8x128xf32>
    %462 = vector.extract_strided_slice %460 {offsets = [8, 0], sizes = [8, 128], strides = [1, 1]} : vector<16x128xf32> to vector<8x128xf32>
    %463 = arith.subf %461, %462 : vector<8x128xf32>
    %464 = math.absf %463 : vector<8x128xf32>
    %465 = arith.mulf %464, %464 : vector<8x128xf32>
    %cst_173 = arith.constant dense<0.000000e+00> : vector<8xf32>
    %466 = vector.multi_reduction <add>, %465, %cst_173 [1] : vector<8x128xf32> to vector<8xf32>
    %467 = vector.shape_cast %466 : vector<8xf32> to vector<8x1xf32>
    %c0_174 = arith.constant 0 : index
    %c0_175 = arith.constant 0 : index
    %c0_176 = arith.constant 0 : index
    %468 = vector.load %arg5[%c0_174, %c0_175, %c0_176] : memref<1x1x1xf32, #tpu.memory_space<vmem>>, vector<1x1x1xf32>
    %469 = vector.shape_cast %468 : vector<1x1x1xf32> to vector<1x1xf32>
    %cst_177 = arith.constant dense<0.000000e+00> : vector<1xf32>
    %470 = vector.multi_reduction <add>, %467, %cst_177 [0] : vector<8x1xf32> to vector<1xf32>
    %471 = vector.shape_cast %470 : vector<1xf32> to vector<1x1xf32>
    %472 = arith.addf %469, %471 : vector<1x1xf32>
    %c0_178 = arith.constant 0 : index
    %c0_179 = arith.constant 0 : index
    %c0_180 = arith.constant 0 : index
    %473 = vector.load %arg5[%c0_178, %c0_179, %c0_180] : memref<1x1x1xf32, #tpu.memory_space<vmem>>, vector<1x1x1xf32>
    %474 = vector.shape_cast %473 : vector<1x1x1xf32> to vector<1x1xf32>
    %475 = vector.shape_cast %472 : vector<1x1xf32> to vector<1x1x1xf32>
    tpu.vector_store %arg5[%c0_178, %c0_179, %c0_180], %475 {strides = array<i32>} : memref<1x1x1xf32, #tpu.memory_space<vmem>>, vector<1x1x1xf32>,
    %c0_181 = arith.constant 0 : index
    %c0_182 = arith.constant 0 : index
    %c0_183 = arith.constant 0 : index
    %476 = vector.load %arg6[%c0_181, %c0_182, %c0_183] : memref<1x1x1xf32, #tpu.memory_space<vmem>>, vector<1x1x1xf32>
    %477 = vector.shape_cast %476 : vector<1x1x1xf32> to vector<1x1xf32>
    %478 = arith.mulf %467, %467 : vector<8x1xf32>
    %cst_184 = arith.constant dense<0.000000e+00> : vector<1xf32>
    %479 = vector.multi_reduction <add>, %478, %cst_184 [0] : vector<8x1xf32> to vector<1xf32>
    %480 = vector.shape_cast %479 : vector<1xf32> to vector<1x1xf32>
    %481 = arith.addf %477, %480 : vector<1x1xf32>
    %c0_185 = arith.constant 0 : index
    %c0_186 = arith.constant 0 : index
    %c0_187 = arith.constant 0 : index
    %482 = vector.load %arg6[%c0_185, %c0_186, %c0_187] : memref<1x1x1xf32, #tpu.memory_space<vmem>>, vector<1x1x1xf32>
    %483 = vector.shape_cast %482 : vector<1x1x1xf32> to vector<1x1xf32>
    %484 = vector.shape_cast %481 : vector<1x1xf32> to vector<1x1x1xf32>
    tpu.vector_store %arg6[%c0_185, %c0_186, %c0_187], %484 {strides = array<i32>} : memref<1x1x1xf32, #tpu.memory_space<vmem>>, vector<1x1x1xf32>,
    %c0_i32_188 = arith.constant 0 : i32
    %485 = arith.cmpi eq, %arg1, %c0_i32_188 : i32
    %486 = arith.extui %485 : i1 to i32
    %c0_i32_189 = arith.constant 0 : i32
    %487 = arith.cmpi ne, %486, %c0_i32_189 : i32
    scf.if %487 {
      %c0_190 = arith.constant 0 : index
      %c0_191 = arith.constant 0 : index
      %c0_192 = arith.constant 0 : index
      %488 = vector.load %arg5[%c0_190, %c0_191, %c0_192] : memref<1x1x1xf32, #tpu.memory_space<vmem>>, vector<1x1x1xf32>
      %489 = vector.shape_cast %488 : vector<1x1x1xf32> to vector<1x1xf32>
      %cst_193 = arith.constant 1.250000e-01 : f32
      %490 = vector.broadcast %cst_193 : f32 to vector<1x1xf32>
      %491 = arith.mulf %489, %490 : vector<1x1xf32>
      %c0_194 = arith.constant 0 : index
      %c0_195 = arith.constant 0 : index
      %c0_196 = arith.constant 0 : index
      %492 = vector.load %arg5[%c0_194, %c0_195, %c0_196] : memref<1x1x1xf32, #tpu.memory_space<vmem>>, vector<1x1x1xf32>
      %493 = vector.shape_cast %492 : vector<1x1x1xf32> to vector<1x1xf32>
      %494 = vector.shape_cast %491 : vector<1x1xf32> to vector<1x1x1xf32>
      tpu.vector_store %arg5[%c0_194, %c0_195, %c0_196], %494 {strides = array<i32>} : memref<1x1x1xf32, #tpu.memory_space<vmem>>, vector<1x1x1xf32>,
      %c0_197 = arith.constant 0 : index
      %c0_198 = arith.constant 0 : index
      %c0_199 = arith.constant 0 : index
      %495 = vector.load %arg6[%c0_197, %c0_198, %c0_199] : memref<1x1x1xf32, #tpu.memory_space<vmem>>, vector<1x1x1xf32>
      %496 = vector.shape_cast %495 : vector<1x1x1xf32> to vector<1x1xf32>
      %cst_200 = arith.constant 1.250000e-01 : f32
      %497 = vector.broadcast %cst_200 : f32 to vector<1x1xf32>
      %498 = arith.mulf %496, %497 : vector<1x1xf32>
      %c0_201 = arith.constant 0 : index
      %c0_202 = arith.constant 0 : index
      %c0_203 = arith.constant 0 : index
      %499 = vector.load %arg6[%c0_201, %c0_202, %c0_203] : memref<1x1x1xf32, #tpu.memory_space<vmem>>, vector<1x1x1xf32>
      %500 = vector.shape_cast %499 : vector<1x1x1xf32> to vector<1x1xf32>
      %501 = vector.shape_cast %498 : vector<1x1xf32> to vector<1x1x1xf32>
      tpu.vector_store %arg6[%c0_201, %c0_202, %c0_203], %501 {strides = array<i32>} : memref<1x1x1xf32, #tpu.memory_space<vmem>>, vector<1x1x1xf32>,
    } else {
    }
    return
  }
  func.func @transform_0(%arg0: i32, %arg1: i32) -> (i32, i32, i32) {
    %c0_i32 = arith.constant 0 : i32
    %c0_i32_0 = arith.constant 0 : i32
    return %arg0, %arg1, %c0_i32 : i32, i32, i32
  }
  func.func @transform_1(%arg0: i32, %arg1: i32) -> (i32, i32, i32) {
    %c0_i32 = arith.constant 0 : i32
    %c0_i32_0 = arith.constant 0 : i32
    %c0_i32_1 = arith.constant 0 : i32
    return %arg0, %c0_i32, %c0_i32_0 : i32, i32, i32
  }
  func.func @transform_2(%arg0: i32, %arg1: i32) -> (i32, i32, i32) {
    %c0_i32 = arith.constant 0 : i32
    %c0_i32_0 = arith.constant 0 : i32
    %c0_i32_1 = arith.constant 0 : i32
    return %arg0, %c0_i32, %c0_i32_0 : i32, i32, i32
  }
  func.func @transform_3(%arg0: i32, %arg1: i32) -> (i32, i32, i32) {
    %c0_i32 = arith.constant 0 : i32
    %c0_i32_0 = arith.constant 0 : i32
    %c0_i32_1 = arith.constant 0 : i32
    return %arg0, %c0_i32, %c0_i32_0 : i32, i32, i32
  }
  func.func @transform_4(%arg0: i32, %arg1: i32) -> (i32, i32, i32) {
    %c0_i32 = arith.constant 0 : i32
    %c0_i32_0 = arith.constant 0 : i32
    %c0_i32_1 = arith.constant 0 : i32
    return %arg0, %c0_i32, %c0_i32_0 : i32, i32, i32
  }
}

</mosaic_0001>

<bundles_post_ra>
// kernel: compute_practical_moments_sw.1
= control target key start
LH: loop header
LB: loop body
LE: loop exit
PB: predicated region body
PF: predicated region fallthrough
CT: control target
= control target key end

     0   :  { %s1090_s15 = smov 0   ;;  %s1092_s16 = smov 0   ;;  %s1545_s0 = inlined_call_operand.vmem [shape: f32[2,8,3], index: 0, kind: input, shape index: {}]   ;;  %s1546_s1 = inlined_call_operand.vmem [shape: f32[2,3,128], index: 1, kind: input, shape index: {}]   ;;  %s1547_s2 = inlined_call_operand.vmem [shape: f32[2,3,128], index: 2, kind: input, shape index: {}]   ;;  %s1548_s3 = inlined_call_operand.vmem [shape: f32[2,1,1], index: 3, kind: output, shape index: {0}]   ;;  %s1549_s4 = inlined_call_operand.vmem [shape: f32[2,1,1], index: 4, kind: output, shape index: {1}]  }
   0x1   :  { %s1094_s17 = smov 0  }
   0x2 LB: > { %s27_s18 = sadd.s32 1, %s1041_s16  ;;  %p969_p0 = scmp.ge.s32.totalorder %s1045_s17, 1  ;;  %s1045_s17 = sphi %s1094_s17, %s15_s17   ;;  %s1041_s16 = sphi %s1092_s16, %s1565_s16   ;;  %s1037_s15 = sphi %s1090_s15, %s1564_s15  }
   0x3   : > { %p29_p1 = scmp.ge.s32.totalorder %s27_s18, 2  ;;  %p199_p2 = scmp.lt.s32.totalorder %s1045_s17, 3 }
   0x5   : > { %s1567_s18 = smov (%p29_p1, %s27_s18), 0  ;;  %p200_p3 = pnand %p969_p0, %p199_p2 }
   0x6   : > { %p236_p4 = scmp.lt.s32.totalorder (!%p200_p3), %s1037_s15, 1  ;;  %vm266_vm0 = vcmask (!%p200_p3), 23552   ;;  %v1047_v3 = vmov (!%p200_p3), 1   ;;  %v1048_v4 = vmov (!%p200_p3), 0   ;;  %v1049_v8 = vmov (!%p200_p3), 2   ;;  %s1050_s30 = smov (!%p200_p3), 127  }
   0x7   : > { %203 = sbr.rel (%p200_p3) target bundleno = 3940 (0xf64), region = 32  ;;  %1018 = vset.pattern.permute.xlu1 (!%p200_p3), %v1047_v3  ;;  %1017 = vset.pattern.permute.xlu0 (!%p200_p3), %v1048_v4  ;;  %v279_v9 = vlaneseq (!%p200_p3)  ;;  %s1051_s5 = smov (!%p200_p3), 1   ;;  %vm1052_vm5 = vmmov (!%p200_p3), 1  }
   0x8   : > { %s1053_s6 = smov (!%p200_p3), 126   ;;  %s1054_s7 = smov (!%p200_p3), 2  }
   0x9   : > { %v280_v10 = vshrl.u32 (!%p200_p3), %v279_v9, 7  ;;  %v1121_v26 = vand.u32 (!%p200_p3), 127, %v279_v9  ;;  %s1055_s8 = smov (!%p200_p3), 124   ;;  %s1056_s9 = smov (!%p200_p3), 4  }
   0xa   : > { %s1057_s10 = smov (!%p200_p3), 120   ;;  %s1058_s11 = smov (!%p200_p3), 8  }
   0xb   : > { %v295_v11 = vsub.s32 (!%p200_p3), 1, %v280_v10  ;;  %v281_v12 = vsub.s32 (!%p200_p3), 0, %v280_v10  ;;  %v311_v17 = vsub.s32 (!%p200_p3), 2, %v280_v10  ;;  %vm323_vm1 = vcmp.ge.s32.totalorder (!%p200_p3), %v1121_v26, 16  ;;  %s1059_s12 = smov (!%p200_p3), 112   ;;  %s1060_s13 = smov (!%p200_p3), 16  }
   0xc   : > { %v334_v38 = vand.u32 (!%p200_p3), 1, %v1121_v26  ;;  %v338_v39 = vand.u32 (!%p200_p3), 2, %v1121_v26  ;;  %v358_v54 = vand.u32 (!%p200_p3), 4, %v1121_v26  ;;  %s1061_s14 = smov (!%p200_p3), 96   ;;  %s1063_s20 = smov (!%p200_p3), 64  }
   0xe   : > { %s1569_s15 = smov (!%p236_p4, %s1037_s15), 1  ;;  %vm1130_vm2 = vcmp.eq.s32.totalorder %v334_v38, 0  ;;  %vm1134_vm3 = vcmp.eq.s32.totalorder %v338_v39, 0  ;;  %vm1152_vm7 = vcmp.eq.s32.totalorder %v358_v54, 0 }
   0xf   : > { %s970_s19 = sshll.u32 %s1569_s15, 3  ;;  %s971_s23 = sshll.u32 %s1569_s15, 2  ;;  %vm340_vm4 = vmxor %vm1130_vm2, %vm1134_vm3 }
  0x10   : > { %s242_s22 = scalar_lea.vmem %s1545_s0, %s970_s19  ;;  %s246_s26 = scalar_lea.vmem %s1546_s1, %s971_s23  ;;  %vm341_vm6 = vmxor %vm340_vm4, %vm1052_vm5 }
  0x11   : > { %v264_v0 = vld [vmem:[%s242_s22] sm:$0xff]  ;;  %s250_s29 = scalar_lea.vmem %s1547_s2, %s971_s23  ;;  %vm360_vm8 = vmxor %vm1134_vm3, %vm1152_vm7  ;;  %s1062_s19 = smov 32  }
  0x12   : > { %v265_v1 = vmul.f32 %v264_v0, %v264_v0  ;;  %v272_v13 = vld [vmem:[%s246_s26] sm:$0x7]  ;;  %vm361_vm9 = vmxor %vm360_vm8, %vm1052_vm5  ;;  %s1503_s23 = scalar_lea.vmem %s1548_s3, %s1569_s15  ;;  %s1509_s26 = scalar_lea.vmem %s1549_s4, %s1569_s15 }
  0x13   : > { %v273_v14 = vld [vmem:[%s250_s29] sm:$0x7]  ;;  %v296_v15 = vrot.slane %v272_v13, %v295_v11  ;;  %v282_v16 = vrot.slane %v272_v13, %v281_v12  ;;  %v312_v24 = vrot.slane %v272_v13, %v311_v17  ;;  %vm378_vm10 = vmxor %vm1130_vm2, %vm1152_vm7 }
  0x14   : > { %v267_v2 = vsel %vm266_vm0, %v265_v1, 0.0  ;;  %v302_v18 = vrot.slane %v273_v14, %v295_v11  ;;  %v287_v20 = vrot.slane %v273_v14, %v281_v12  ;;  %v318_v25 = vrot.slane %v273_v14, %v311_v17  ;;  %vm379_vm11 = vmxor %vm378_vm10, %vm1052_vm5 }
  0x15   : > { %268 = vadd.xlane.f32.xlu0 %v267_v2 }
  0xa2   : > { %v269_v5 = vpop.xlane.xlu0 %268 }
  0xa3   : > { %1021 = vrsqrt.f32 %v269_v5 }
  0xad   : > { %v1022_v6 = vpop.eup %1021 }
  0xae   : > { %v271_v7 = vmul.f32 %v1022_v6, %v264_v0 }
  0xb0   : > { %290 = vperm.xlu1 %1018, %v271_v7   ;;  %276 = vperm.xlu0 %1017, %v271_v7  }
  0xb4   : > { %1019 = vset.pattern.permute.xlu1 %v1049_v8  ;;  %1020 = vset.pattern.permute.xlu0 %v1049_v8 }
  0xb5   : > { %306 = vperm.xlu1 %1019, %v271_v7  }
 0x12f   : > { %v291_v19 = vpop.permute.xlu1 %290  ;;  %v277_v21 = vpop.permute.xlu0 %276 }
 0x130   : > { %v297_v22 = vmul.f32 %v296_v15, %v291_v19  ;;  %v283_v23 = vmul.f32 %v282_v16, %v277_v21  ;;  %v303_v27 = vmul.f32 %v302_v18, %v291_v19  ;;  %v288_v28 = vmul.f32 %v287_v20, %v277_v21 }
 0x131   : > { %v396_v16 = vand.u32 8, %v1121_v26 }
 0x132   : > { %v298_v30 = vadd.f32 %v297_v22, %v283_v23  ;;  %v304_v33 = vadd.f32 %v303_v27, %v288_v28 }
 0x133   : > { %vm1183_vm12 = vcmp.eq.s32.totalorder %v396_v16, 0 }
 0x134   : > { %v307_v29 = vpop.permute.xlu1 %306  ;;  %vm398_vm13 = vmxor %vm1152_vm7, %vm1183_vm12 }
 0x135   : > { %v313_v31 = vmul.f32 %v312_v24, %v307_v29  ;;  %v319_v32 = vmul.f32 %v318_v25, %v307_v29  ;;  %vm399_vm14 = vmxor %vm398_vm13, %vm1052_vm5 }
 0x136   : > { %vm416_vm15 = vmxor %vm1134_vm3, %vm1183_vm12 }
 0x137   : > { %v314_v34 = vadd.f32 %v313_v31, %v298_v30  ;;  %v320_v36 = vadd.f32 %v319_v32, %v304_v33  ;;  %vm417_vm0 = vmxor %vm416_vm15, %vm1052_vm5 }
 0x139   : > { %v324_v35 = vsel %vm323_vm1, 1e+30, %v314_v34  ;;  %v325_v37 = vsel %vm323_vm1, 1e+30, %v320_v36  ;;  %vm434_vm1 = vmxor %vm1130_vm2, %vm1183_vm12 }
 0x13a   : > { %326 = vrot.lane.b32.xlu1 %v324_v35, %s1050_s30  ;;  %vm435_vm4 = vmxor %vm434_vm1, %vm1052_vm5 }
 0x13e   : > { %328 = vrot.lane.b32.xlu1 %v325_v37, %s1050_s30 }
 0x142   : > { %330 = vrot.lane.b32.xlu1 %v324_v35, %s1051_s5 }
 0x146   : > { %332 = vrot.lane.b32.xlu1 %v325_v37, %s1051_s5 }
 0x1ac   : > { %v327_v40 = vpop.permute.xlu1 %326 }
 0x1b0   : > { %v329_v43 = vpop.permute.xlu1 %328 }
 0x1b4   : > { %v331_v44 = vpop.permute.xlu1 %330 }
 0x1b5   : > { %v336_v45 = vsel %vm1130_vm2, %v327_v40, %v331_v44 }
 0x1b6   : > { %v342_v46 = vmin.f32 %v324_v35, %v336_v45  ;;  %v344_v47 = vmax.f32 %v324_v35, %v336_v45 }
 0x1b8   : > { %v333_v48 = vpop.permute.xlu1 %332  ;;  %v346_v49 = vsel %vm341_vm6, %v342_v46, %v344_v47 }
 0x1b9   : > { %v337_v50 = vsel %vm1130_vm2, %v329_v43, %v333_v48  ;;  %348 = vrot.lane.b32.xlu1 %v346_v49, %s1053_s6 }
 0x1ba   : > { %v343_v51 = vmin.f32 %v325_v37, %v337_v50  ;;  %v345_v52 = vmax.f32 %v325_v37, %v337_v50 }
 0x1bc   : > { %v347_v53 = vsel %vm341_vm6, %v343_v51, %v345_v52 }
 0x1bd   : > { %350 = vrot.lane.b32.xlu1 %v347_v53, %s1053_s6 }
 0x1c1   : > { %352 = vrot.lane.b32.xlu1 %v346_v49, %s1054_s7 }
 0x1c5   : > { %354 = vrot.lane.b32.xlu1 %v347_v53, %s1054_s7 }
 0x22b   : > { %v349_v55 = vpop.permute.xlu1 %348 }
 0x22f   : > { %v351_v57 = vpop.permute.xlu1 %350 }
 0x233   : > { %v353_v58 = vpop.permute.xlu1 %352 }
 0x234   : > { %v356_v59 = vsel %vm1134_vm3, %v349_v55, %v353_v58  ;;  %v452_v58 = vand.u32 16, %v1121_v26 }
 0x235   : > { %v362_v60 = vmin.f32 %v346_v49, %v356_v59  ;;  %v364_v61 = vmax.f32 %v346_v49, %v356_v59 }
 0x236   : > { %vm1227_vm6 = vcmp.eq.s32.totalorder %v452_v58, 0 }
 0x237   : > { %v355_v62 = vpop.permute.xlu1 %354  ;;  %v366_v63 = vsel %vm361_vm9, %v362_v60, %v364_v61  ;;  %vm454_vm8 = vmxor %vm1183_vm12, %vm1227_vm6 }
 0x238   : > { %v357_v0 = vsel %vm1134_vm3, %v351_v57, %v355_v62  ;;  %372 = vrot.lane.b32.xlu0 %v366_v63, %s1051_s5  ;;  %368 = vrot.lane.b32.xlu1 %v366_v63, %s1050_s30  ;;  %vm472_vm10 = vmxor %vm1152_vm7, %vm1227_vm6 }
 0x239   : > { %v363_v1 = vmin.f32 %v347_v53, %v357_v0  ;;  %v365_v2 = vmax.f32 %v347_v53, %v357_v0  ;;  %vm490_vm13 = vmxor %vm1134_vm3, %vm1227_vm6 }
 0x23a   : > { %vm508_vm15 = vmxor %vm1130_vm2, %vm1227_vm6 }
 0x23b   : > { %v367_v3 = vsel %vm361_vm9, %v363_v1, %v365_v2  ;;  %vm455_vm9 = vmxor %vm454_vm8, %vm1052_vm5 }
 0x23c   : > { %370 = vrot.lane.b32.xlu1 %v367_v3, %s1050_s30 }
 0x240   : > { %374 = vrot.lane.b32.xlu1 %v367_v3, %s1051_s5 }
 0x2aa   : > { %v373_v4 = vpop.permute.xlu0 %372  ;;  %v369_v5 = vpop.permute.xlu1 %368 }
 0x2ab   : > { %v376_v6 = vsel %vm1130_vm2, %v369_v5, %v373_v4 }
 0x2ac   : > { %v380_v7 = vmin.f32 %v366_v63, %v376_v6  ;;  %v382_v8 = vmax.f32 %v366_v63, %v376_v6 }
 0x2ae   : > { %v371_v9 = vpop.permute.xlu1 %370  ;;  %v384_v10 = vsel %vm379_vm11, %v380_v7, %v382_v8 }
 0x2af   : > { %386 = vrot.lane.b32.xlu0 %v384_v10, %s1055_s8 }
 0x2b2   : > { %v375_v11 = vpop.permute.xlu1 %374 }
 0x2b3   : > { %v377_v12 = vsel %vm1130_vm2, %v371_v9, %v375_v11  ;;  %390 = vrot.lane.b32.xlu0 %v384_v10, %s1056_s9 }
 0x2b4   : > { %v381_v13 = vmin.f32 %v367_v3, %v377_v12  ;;  %v383_v14 = vmax.f32 %v367_v3, %v377_v12 }
 0x2b6   : > { %v385_v15 = vsel %vm379_vm11, %v381_v13, %v383_v14  ;;  %vm473_vm11 = vmxor %vm472_vm10, %vm1052_vm5 }
 0x2b7   : > { %388 = vrot.lane.b32.xlu1 %v385_v15, %s1055_s8 }
 0x2bb   : > { %392 = vrot.lane.b32.xlu1 %v385_v15, %s1056_s9 }
 0x321   : > { %v387_v18 = vpop.permute.xlu0 %386 }
 0x325   : > { %v391_v19 = vpop.permute.xlu0 %390 }
 0x326   : > { %v394_v20 = vsel %vm1152_vm7, %v387_v18, %v391_v19 }
 0x327   : > { %v400_v21 = vmin.f32 %v384_v10, %v394_v20  ;;  %v402_v22 = vmax.f32 %v384_v10, %v394_v20 }
 0x329   : > { %v389_v23 = vpop.permute.xlu1 %388  ;;  %v404_v24 = vsel %vm399_vm14, %v400_v21, %v402_v22 }
 0x32a   : > { %406 = vrot.lane.b32.xlu0 %v404_v24, %s1053_s6 }
 0x32d   : > { %v393_v25 = vpop.permute.xlu1 %392 }
 0x32e   : > { %v395_v27 = vsel %vm1152_vm7, %v389_v23, %v393_v25  ;;  %410 = vrot.lane.b32.xlu0 %v404_v24, %s1054_s7 }
 0x32f   : > { %v401_v28 = vmin.f32 %v385_v15, %v395_v27  ;;  %v403_v29 = vmax.f32 %v385_v15, %v395_v27 }
 0x331   : > { %v405_v30 = vsel %vm399_vm14, %v401_v28, %v403_v29  ;;  %vm491_vm14 = vmxor %vm490_vm13, %vm1052_vm5 }
 0x332   : > { %408 = vrot.lane.b32.xlu1 %v405_v30, %s1053_s6 }
 0x336   : > { %412 = vrot.lane.b32.xlu1 %v405_v30, %s1054_s7 }
 0x39c   : > { %v407_v31 = vpop.permute.xlu0 %406 }
 0x3a0   : > { %v411_v32 = vpop.permute.xlu0 %410 }
 0x3a1   : > { %v414_v33 = vsel %vm1134_vm3, %v407_v31, %v411_v32 }
 0x3a2   : > { %v418_v34 = vmin.f32 %v404_v24, %v414_v33  ;;  %v420_v35 = vmax.f32 %v404_v24, %v414_v33 }
 0x3a4   : > { %v409_v36 = vpop.permute.xlu1 %408  ;;  %v422_v37 = vsel %vm417_vm0, %v418_v34, %v420_v35 }
 0x3a5   : > { %424 = vrot.lane.b32.xlu0 %v422_v37, %s1050_s30 }
 0x3a8   : > { %v413_v38 = vpop.permute.xlu1 %412 }
 0x3a9   : > { %v415_v39 = vsel %vm1134_vm3, %v409_v36, %v413_v38  ;;  %428 = vrot.lane.b32.xlu0 %v422_v37, %s1051_s5 }
 0x3aa   : > { %v419_v40 = vmin.f32 %v405_v30, %v415_v39  ;;  %v421_v43 = vmax.f32 %v405_v30, %v415_v39 }
 0x3ac   : > { %v423_v44 = vsel %vm417_vm0, %v419_v40, %v421_v43  ;;  %vm509_vm0 = vmxor %vm508_vm15, %vm1052_vm5 }
 0x3ad   : > { %426 = vrot.lane.b32.xlu1 %v423_v44, %s1050_s30 }
 0x3b1   : > { %430 = vrot.lane.b32.xlu1 %v423_v44, %s1051_s5 }
 0x417   : > { %v425_v45 = vpop.permute.xlu0 %424 }
 0x41b   : > { %v429_v46 = vpop.permute.xlu0 %428 }
 0x41c   : > { %v432_v47 = vsel %vm1130_vm2, %v425_v45, %v429_v46 }
 0x41d   : > { %v436_v48 = vmin.f32 %v422_v37, %v432_v47  ;;  %v438_v49 = vmax.f32 %v422_v37, %v432_v47 }
 0x41f   : > { %v427_v50 = vpop.permute.xlu1 %426  ;;  %v440_v51 = vsel %vm435_vm4, %v436_v48, %v438_v49  ;;  %v526_v48 = vand.u32 32, %v1121_v26 }
 0x420   : > { %442 = vrot.lane.b32.xlu0 %v440_v51, %s1057_s10 }
 0x421   : > { %vm1284_vm1 = vcmp.eq.s32.totalorder %v526_v48, 0 }
 0x423   : > { %v431_v52 = vpop.permute.xlu1 %430 }
 0x424   : > { %v433_v53 = vsel %vm1130_vm2, %v427_v50, %v431_v52  ;;  %446 = vrot.lane.b32.xlu0 %v440_v51, %s1058_s11 }
 0x425   : > { %v437_v54 = vmin.f32 %v423_v44, %v433_v53  ;;  %v439_v55 = vmax.f32 %v423_v44, %v433_v53 }
 0x427   : > { %v441_v57 = vsel %vm435_vm4, %v437_v54, %v439_v55  ;;  %vm528_vm4 = vmxor %vm1227_vm6, %vm1284_vm1 }
 0x428   : > { %444 = vrot.lane.b32.xlu1 %v441_v57, %s1057_s10  ;;  %vm529_vm8 = vmxor %vm528_vm4, %vm1052_vm5 }
 0x42c   : > { %448 = vrot.lane.b32.xlu1 %v441_v57, %s1058_s11 }
 0x492   : > { %v443_v60 = vpop.permute.xlu0 %442 }
 0x496   : > { %v447_v61 = vpop.permute.xlu0 %446 }
 0x497   : > { %v450_v62 = vsel %vm1183_vm12, %v443_v60, %v447_v61 }
 0x498   : > { %v456_v63 = vmin.f32 %v440_v51, %v450_v62  ;;  %v458_v0 = vmax.f32 %v440_v51, %v450_v62 }
 0x49a   : > { %v445_v1 = vpop.permute.xlu1 %444  ;;  %v460_v2 = vsel %vm455_vm9, %v456_v63, %v458_v0 }
 0x49b   : > { %462 = vrot.lane.b32.xlu0 %v460_v2, %s1055_s8 }
 0x49e   : > { %v449_v3 = vpop.permute.xlu1 %448 }
 0x49f   : > { %v451_v4 = vsel %vm1183_vm12, %v445_v1, %v449_v3  ;;  %466 = vrot.lane.b32.xlu0 %v460_v2, %s1056_s9 }
 0x4a0   : > { %v457_v5 = vmin.f32 %v441_v57, %v451_v4  ;;  %v459_v6 = vmax.f32 %v441_v57, %v451_v4 }
 0x4a2   : > { %v461_v7 = vsel %vm455_vm9, %v457_v5, %v459_v6  ;;  %vm546_vm9 = vmxor %vm1183_vm12, %vm1284_vm1 }
 0x4a3   : > { %464 = vrot.lane.b32.xlu1 %v461_v7, %s1055_s8  ;;  %vm547_vm10 = vmxor %vm546_vm9, %vm1052_vm5 }
 0x4a7   : > { %468 = vrot.lane.b32.xlu1 %v461_v7, %s1056_s9 }
 0x50d   : > { %v463_v8 = vpop.permute.xlu0 %462 }
 0x511   : > { %v467_v9 = vpop.permute.xlu0 %466 }
 0x512   : > { %v470_v10 = vsel %vm1152_vm7, %v463_v8, %v467_v9 }
 0x513   : > { %v474_v11 = vmin.f32 %v460_v2, %v470_v10  ;;  %v476_v12 = vmax.f32 %v460_v2, %v470_v10 }
 0x515   : > { %v465_v13 = vpop.permute.xlu1 %464  ;;  %v478_v14 = vsel %vm473_vm11, %v474_v11, %v476_v12 }
 0x516   : > { %480 = vrot.lane.b32.xlu0 %v478_v14, %s1053_s6 }
 0x519   : > { %v469_v15 = vpop.permute.xlu1 %468 }
 0x51a   : > { %v471_v16 = vsel %vm1152_vm7, %v465_v13, %v469_v15  ;;  %484 = vrot.lane.b32.xlu0 %v478_v14, %s1054_s7 }
 0x51b   : > { %v475_v18 = vmin.f32 %v461_v7, %v471_v16  ;;  %v477_v19 = vmax.f32 %v461_v7, %v471_v16 }
 0x51d   : > { %v479_v20 = vsel %vm473_vm11, %v475_v18, %v477_v19  ;;  %vm564_vm11 = vmxor %vm1152_vm7, %vm1284_vm1 }
 0x51e   : > { %482 = vrot.lane.b32.xlu1 %v479_v20, %s1053_s6  ;;  %vm565_vm13 = vmxor %vm564_vm11, %vm1052_vm5 }
 0x522   : > { %486 = vrot.lane.b32.xlu1 %v479_v20, %s1054_s7 }
 0x588   : > { %v481_v21 = vpop.permute.xlu0 %480 }
 0x58c   : > { %v485_v22 = vpop.permute.xlu0 %484 }
 0x58d   : > { %v488_v23 = vsel %vm1134_vm3, %v481_v21, %v485_v22 }
 0x58e   : > { %v492_v24 = vmin.f32 %v478_v14, %v488_v23  ;;  %v494_v25 = vmax.f32 %v478_v14, %v488_v23 }
 0x590   : > { %v483_v27 = vpop.permute.xlu1 %482  ;;  %v496_v28 = vsel %vm491_vm14, %v492_v24, %v494_v25 }
 0x591   : > { %498 = vrot.lane.b32.xlu0 %v496_v28, %s1050_s30 }
 0x594   : > { %v487_v29 = vpop.permute.xlu1 %486 }
 0x595   : > { %v489_v30 = vsel %vm1134_vm3, %v483_v27, %v487_v29  ;;  %502 = vrot.lane.b32.xlu0 %v496_v28, %s1051_s5 }
 0x596   : > { %v493_v31 = vmin.f32 %v479_v20, %v489_v30  ;;  %v495_v32 = vmax.f32 %v479_v20, %v489_v30 }
 0x598   : > { %v497_v33 = vsel %vm491_vm14, %v493_v31, %v495_v32  ;;  %vm582_vm14 = vmxor %vm1134_vm3, %vm1284_vm1 }
 0x599   : > { %500 = vrot.lane.b32.xlu1 %v497_v33, %s1050_s30  ;;  %vm583_vm15 = vmxor %vm582_vm14, %vm1052_vm5 }
 0x59d   : > { %504 = vrot.lane.b32.xlu1 %v497_v33, %s1051_s5 }
 0x603   : > { %v499_v34 = vpop.permute.xlu0 %498 }
 0x607   : > { %v503_v35 = vpop.permute.xlu0 %502 }
 0x608   : > { %v506_v36 = vsel %vm1130_vm2, %v499_v34, %v503_v35 }
 0x609   : > { %v510_v37 = vmin.f32 %v496_v28, %v506_v36  ;;  %v512_v38 = vmax.f32 %v496_v28, %v506_v36 }
 0x60b   : > { %v501_v39 = vpop.permute.xlu1 %500  ;;  %v514_v40 = vsel %vm509_vm0, %v510_v37, %v512_v38 }
 0x60c   : > { %516 = vrot.lane.b32.xlu0 %v514_v40, %s1059_s12 }
 0x60f   : > { %v505_v43 = vpop.permute.xlu1 %504 }
 0x610   : > { %v507_v44 = vsel %vm1130_vm2, %v501_v39, %v505_v43  ;;  %520 = vrot.lane.b32.xlu0 %v514_v40, %s1060_s13 }
 0x611   : > { %v511_v45 = vmin.f32 %v497_v33, %v507_v44  ;;  %v513_v46 = vmax.f32 %v497_v33, %v507_v44 }
 0x613   : > { %v515_v47 = vsel %vm509_vm0, %v511_v45, %v513_v46  ;;  %vm600_vm0 = vmxor %vm1130_vm2, %vm1284_vm1 }
 0x614   : > { %518 = vrot.lane.b32.xlu1 %v515_v47, %s1059_s12  ;;  %vm601_vm4 = vmxor %vm600_vm0, %vm1052_vm5 }
 0x618   : > { %522 = vrot.lane.b32.xlu1 %v515_v47, %s1060_s13 }
 0x67e   : > { %v517_v50 = vpop.permute.xlu0 %516 }
 0x682   : > { %v521_v51 = vpop.permute.xlu0 %520 }
 0x683   : > { %v524_v52 = vsel %vm1227_vm6, %v517_v50, %v521_v51 }
 0x684   : > { %v530_v53 = vmin.f32 %v514_v40, %v524_v52  ;;  %v532_v54 = vmax.f32 %v514_v40, %v524_v52 }
 0x686   : > { %v519_v55 = vpop.permute.xlu1 %518  ;;  %v534_v57 = vsel %vm529_vm8, %v530_v53, %v532_v54  ;;  %v618_v53 = vand.u32 64, %v1121_v26 }
 0x687   : > { %536 = vrot.lane.b32.xlu0 %v534_v57, %s1057_s10 }
 0x68a   : > { %v523_v58 = vpop.permute.xlu1 %522 }
 0x68b   : > { %v525_v60 = vsel %vm1227_vm6, %v519_v55, %v523_v58  ;;  %540 = vrot.lane.b32.xlu0 %v534_v57, %s1058_s11 }
 0x68c   : > { %v531_v61 = vmin.f32 %v515_v47, %v525_v60  ;;  %v533_v62 = vmax.f32 %v515_v47, %v525_v60 }
 0x68e   : > { %v535_v63 = vsel %vm529_vm8, %v531_v61, %v533_v62  ;;  %vm1354_vm8 = vcmp.eq.s32.totalorder %v618_v53, 0 }
 0x68f   : > { %538 = vrot.lane.b32.xlu1 %v535_v63, %s1057_s10  ;;  %vm620_vm9 = vmxor %vm1284_vm1, %vm1354_vm8 }
 0x690   : > { %vm638_vm11 = vmxor %vm1227_vm6, %vm1354_vm8 }
 0x691   : > { %vm656_vm14 = vmxor %vm1183_vm12, %vm1354_vm8 }
 0x692   : > { %vm674_vm0 = vmxor %vm1152_vm7, %vm1354_vm8 }
 0x693   : > { %542 = vrot.lane.b32.xlu1 %v535_v63, %s1058_s11 }
 0x6f9   : > { %v537_v0 = vpop.permute.xlu0 %536 }
 0x6fd   : > { %v541_v1 = vpop.permute.xlu0 %540 }
 0x6fe   : > { %v544_v2 = vsel %vm1183_vm12, %v537_v0, %v541_v1 }
 0x6ff   : > { %v548_v3 = vmin.f32 %v534_v57, %v544_v2  ;;  %v550_v4 = vmax.f32 %v534_v57, %v544_v2 }
 0x701   : > { %v539_v5 = vpop.permute.xlu1 %538  ;;  %v552_v6 = vsel %vm547_vm10, %v548_v3, %v550_v4 }
 0x702   : > { %554 = vrot.lane.b32.xlu0 %v552_v6, %s1055_s8 }
 0x705   : > { %v543_v7 = vpop.permute.xlu1 %542 }
 0x706   : > { %v545_v8 = vsel %vm1183_vm12, %v539_v5, %v543_v7  ;;  %558 = vrot.lane.b32.xlu0 %v552_v6, %s1056_s9 }
 0x707   : > { %v549_v9 = vmin.f32 %v535_v63, %v545_v8  ;;  %v551_v10 = vmax.f32 %v535_v63, %v545_v8 }
 0x709   : > { %v553_v11 = vsel %vm547_vm10, %v549_v9, %v551_v10  ;;  %vm621_vm10 = vmxor %vm620_vm9, %vm1052_vm5 }
 0x70a   : > { %556 = vrot.lane.b32.xlu1 %v553_v11, %s1055_s8  ;;  %vm692_vm9 = vmxor %vm1134_vm3, %vm1354_vm8 }
 0x70e   : > { %560 = vrot.lane.b32.xlu1 %v553_v11, %s1056_s9 }
 0x774   : > { %v555_v12 = vpop.permute.xlu0 %554 }
 0x778   : > { %v559_v13 = vpop.permute.xlu0 %558 }
 0x779   : > { %v562_v14 = vsel %vm1152_vm7, %v555_v12, %v559_v13 }
 0x77a   : > { %v566_v15 = vmin.f32 %v552_v6, %v562_v14  ;;  %v568_v16 = vmax.f32 %v552_v6, %v562_v14 }
 0x77c   : > { %v557_v18 = vpop.permute.xlu1 %556  ;;  %v570_v19 = vsel %vm565_vm13, %v566_v15, %v568_v16 }
 0x77d   : > { %572 = vrot.lane.b32.xlu0 %v570_v19, %s1053_s6 }
 0x780   : > { %v561_v20 = vpop.permute.xlu1 %560 }
 0x781   : > { %v563_v21 = vsel %vm1152_vm7, %v557_v18, %v561_v20  ;;  %576 = vrot.lane.b32.xlu0 %v570_v19, %s1054_s7 }
 0x782   : > { %v567_v22 = vmin.f32 %v553_v11, %v563_v21  ;;  %v569_v23 = vmax.f32 %v553_v11, %v563_v21 }
 0x784   : > { %v571_v24 = vsel %vm565_vm13, %v567_v22, %v569_v23  ;;  %vm639_vm13 = vmxor %vm638_vm11, %vm1052_vm5 }
 0x785   : > { %574 = vrot.lane.b32.xlu1 %v571_v24, %s1053_s6  ;;  %vm710_vm11 = vmxor %vm1130_vm2, %vm1354_vm8 }
 0x789   : > { %578 = vrot.lane.b32.xlu1 %v571_v24, %s1054_s7 }
 0x7ef   : > { %v573_v25 = vpop.permute.xlu0 %572 }
 0x7f3   : > { %v577_v27 = vpop.permute.xlu0 %576 }
 0x7f4   : > { %v580_v28 = vsel %vm1134_vm3, %v573_v25, %v577_v27 }
 0x7f5   : > { %v584_v29 = vmin.f32 %v570_v19, %v580_v28  ;;  %v586_v30 = vmax.f32 %v570_v19, %v580_v28 }
 0x7f7   : > { %v575_v31 = vpop.permute.xlu1 %574  ;;  %v588_v32 = vsel %vm583_vm15, %v584_v29, %v586_v30 }
 0x7f8   : > { %590 = vrot.lane.b32.xlu0 %v588_v32, %s1050_s30 }
 0x7fb   : > { %v579_v33 = vpop.permute.xlu1 %578 }
 0x7fc   : > { %v581_v34 = vsel %vm1134_vm3, %v575_v31, %v579_v33  ;;  %594 = vrot.lane.b32.xlu0 %v588_v32, %s1051_s5 }
 0x7fd   : > { %v585_v35 = vmin.f32 %v571_v24, %v581_v34  ;;  %v587_v36 = vmax.f32 %v571_v24, %v581_v34 }
 0x7ff   : > { %v589_v37 = vsel %vm583_vm15, %v585_v35, %v587_v36  ;;  %vm657_vm15 = vmxor %vm656_vm14, %vm1052_vm5 }
 0x800   : > { %592 = vrot.lane.b32.xlu1 %v589_v37, %s1050_s30 }
 0x804   : > { %596 = vrot.lane.b32.xlu1 %v589_v37, %s1051_s5 }
 0x86a   : > { %v591_v38 = vpop.permute.xlu0 %590 }
 0x86e   : > { %v595_v39 = vpop.permute.xlu0 %594 }
 0x86f   : > { %v598_v40 = vsel %vm1130_vm2, %v591_v38, %v595_v39 }
 0x870   : > { %v602_v43 = vmin.f32 %v588_v32, %v598_v40  ;;  %v604_v44 = vmax.f32 %v588_v32, %v598_v40 }
 0x872   : > { %v593_v45 = vpop.permute.xlu1 %592  ;;  %v606_v46 = vsel %vm601_vm4, %v602_v43, %v604_v44 }
 0x873   : > { %608 = vrot.lane.b32.xlu0 %v606_v46, %s1061_s14 }
 0x876   : > { %v597_v47 = vpop.permute.xlu1 %596 }
 0x877   : > { %v599_v48 = vsel %vm1130_vm2, %v593_v45, %v597_v47  ;;  %612 = vrot.lane.b32.xlu0 %v606_v46, %s1062_s19 }
 0x878   : > { %v603_v50 = vmin.f32 %v589_v37, %v599_v48  ;;  %v605_v51 = vmax.f32 %v589_v37, %v599_v48 }
 0x87a   : > { %v607_v52 = vsel %vm601_vm4, %v603_v50, %v605_v51  ;;  %vm675_vm4 = vmxor %vm674_vm0, %vm1052_vm5 }
 0x87b   : > { %610 = vrot.lane.b32.xlu1 %v607_v52, %s1061_s14 }
 0x87f   : > { %614 = vrot.lane.b32.xlu1 %v607_v52, %s1062_s19 }
 0x8e5   : > { %v609_v55 = vpop.permute.xlu0 %608 }
 0x8e9   : > { %v613_v57 = vpop.permute.xlu0 %612 }
 0x8ea   : > { %v616_v58 = vsel %vm1284_vm1, %v609_v55, %v613_v57 }
 0x8eb   : > { %v622_v60 = vmin.f32 %v606_v46, %v616_v58  ;;  %v624_v61 = vmax.f32 %v606_v46, %v616_v58 }
 0x8ed   : > { %v611_v62 = vpop.permute.xlu1 %610  ;;  %v626_v26 = vsel %vm621_vm10, %v622_v60, %v624_v61 }
 0x8ee   : > { %628 = vrot.lane.b32.xlu0 %v626_v26, %s1059_s12 }
 0x8f1   : > { %v615_v63 = vpop.permute.xlu1 %614 }
 0x8f2   : > { %v617_v0 = vsel %vm1284_vm1, %v611_v62, %v615_v63  ;;  %632 = vrot.lane.b32.xlu0 %v626_v26, %s1060_s13 }
 0x8f3   : > { %v623_v1 = vmin.f32 %v607_v52, %v617_v0  ;;  %v625_v2 = vmax.f32 %v607_v52, %v617_v0 }
 0x8f5   : > { %v627_v3 = vsel %vm621_vm10, %v623_v1, %v625_v2  ;;  %vm693_vm10 = vmxor %vm692_vm9, %vm1052_vm5 }
 0x8f6   : > { %630 = vrot.lane.b32.xlu1 %v627_v3, %s1059_s12 }
 0x8fa   : > { %634 = vrot.lane.b32.xlu1 %v627_v3, %s1060_s13 }
 0x960   : > { %v629_v4 = vpop.permute.xlu0 %628 }
 0x964   : > { %v633_v5 = vpop.permute.xlu0 %632 }
 0x965   : > { %v636_v6 = vsel %vm1227_vm6, %v629_v4, %v633_v5 }
 0x966   : > { %v640_v7 = vmin.f32 %v626_v26, %v636_v6  ;;  %v642_v8 = vmax.f32 %v626_v26, %v636_v6 }
 0x968   : > { %v631_v9 = vpop.permute.xlu1 %630  ;;  %v644_v10 = vsel %vm639_vm13, %v640_v7, %v642_v8 }
 0x969   : > { %646 = vrot.lane.b32.xlu0 %v644_v10, %s1057_s10 }
 0x96c   : > { %v635_v11 = vpop.permute.xlu1 %634 }
 0x96d   : > { %v637_v12 = vsel %vm1227_vm6, %v631_v9, %v635_v11  ;;  %650 = vrot.lane.b32.xlu0 %v644_v10, %s1058_s11 }
 0x96e   : > { %v641_v13 = vmin.f32 %v627_v3, %v637_v12  ;;  %v643_v14 = vmax.f32 %v627_v3, %v637_v12 }
 0x970   : > { %v645_v15 = vsel %vm639_vm13, %v641_v13, %v643_v14  ;;  %vm711_vm13 = vmxor %vm710_vm11, %vm1052_vm5  ;;  %vm261_vm5 = vcmask 0  }
 0x971   : > { %648 = vrot.lane.b32.xlu1 %v645_v15, %s1057_s10 }
 0x975   : > { %652 = vrot.lane.b32.xlu1 %v645_v15, %s1058_s11 }
 0x9db   : > { %v647_v16 = vpop.permute.xlu0 %646 }
 0x9df   : > { %v651_v18 = vpop.permute.xlu0 %650 }
 0x9e0   : > { %v654_v19 = vsel %vm1183_vm12, %v647_v16, %v651_v18 }
 0x9e1   : > { %v658_v20 = vmin.f32 %v644_v10, %v654_v19  ;;  %v660_v21 = vmax.f32 %v644_v10, %v654_v19 }
 0x9e3   : > { %v649_v22 = vpop.permute.xlu1 %648  ;;  %v662_v23 = vsel %vm657_vm15, %v658_v20, %v660_v21 }
 0x9e4   : > { %664 = vrot.lane.b32.xlu0 %v662_v23, %s1055_s8 }
 0x9e7   : > { %v653_v24 = vpop.permute.xlu1 %652 }
 0x9e8   : > { %v655_v25 = vsel %vm1183_vm12, %v649_v22, %v653_v24  ;;  %668 = vrot.lane.b32.xlu0 %v662_v23, %s1056_s9 }
 0x9e9   : > { %v659_v27 = vmin.f32 %v645_v15, %v655_v25  ;;  %v661_v28 = vmax.f32 %v645_v15, %v655_v25 }
 0x9eb   : > { %v663_v29 = vsel %vm657_vm15, %v659_v27, %v661_v28 }
 0x9ec   : > { %666 = vrot.lane.b32.xlu1 %v663_v29, %s1055_s8 }
 0x9f0   : > { %670 = vrot.lane.b32.xlu1 %v663_v29, %s1056_s9 }
 0xa56   : > { %v665_v30 = vpop.permute.xlu0 %664 }
 0xa5a   : > { %v669_v31 = vpop.permute.xlu0 %668 }
 0xa5b   : > { %v672_v32 = vsel %vm1152_vm7, %v665_v30, %v669_v31 }
 0xa5c   : > { %v676_v33 = vmin.f32 %v662_v23, %v672_v32  ;;  %v678_v34 = vmax.f32 %v662_v23, %v672_v32 }
 0xa5e   : > { %v667_v35 = vpop.permute.xlu1 %666  ;;  %v680_v36 = vsel %vm675_vm4, %v676_v33, %v678_v34 }
 0xa5f   : > { %682 = vrot.lane.b32.xlu0 %v680_v36, %s1053_s6 }
 0xa62   : > { %v671_v37 = vpop.permute.xlu1 %670 }
 0xa63   : > { %v673_v38 = vsel %vm1152_vm7, %v667_v35, %v671_v37  ;;  %686 = vrot.lane.b32.xlu0 %v680_v36, %s1054_s7 }
 0xa64   : > { %v677_v39 = vmin.f32 %v663_v29, %v673_v38  ;;  %v679_v40 = vmax.f32 %v663_v29, %v673_v38 }
 0xa66   : > { %v681_v43 = vsel %vm675_vm4, %v677_v39, %v679_v40 }
 0xa67   : > { %684 = vrot.lane.b32.xlu1 %v681_v43, %s1053_s6 }
 0xa6b   : > { %688 = vrot.lane.b32.xlu1 %v681_v43, %s1054_s7 }
 0xad1   : > { %v683_v44 = vpop.permute.xlu0 %682 }
 0xad5   : > { %v687_v45 = vpop.permute.xlu0 %686 }
 0xad6   : > { %v690_v46 = vsel %vm1134_vm3, %v683_v44, %v687_v45 }
 0xad7   : > { %v694_v47 = vmin.f32 %v680_v36, %v690_v46  ;;  %v696_v48 = vmax.f32 %v680_v36, %v690_v46 }
 0xad9   : > { %v685_v50 = vpop.permute.xlu1 %684  ;;  %v698_v51 = vsel %vm693_vm10, %v694_v47, %v696_v48 }
 0xada   : > { %700 = vrot.lane.b32.xlu0 %v698_v51, %s1050_s30 }
 0xadd   : > { %v689_v52 = vpop.permute.xlu1 %688 }
 0xade   : > { %v691_v53 = vsel %vm1134_vm3, %v685_v50, %v689_v52  ;;  %704 = vrot.lane.b32.xlu0 %v698_v51, %s1051_s5 }
 0xadf   : > { %v695_v55 = vmin.f32 %v681_v43, %v691_v53  ;;  %v697_v57 = vmax.f32 %v681_v43, %v691_v53 }
 0xae1   : > { %v699_v58 = vsel %vm693_vm10, %v695_v55, %v697_v57 }
 0xae2   : > { %702 = vrot.lane.b32.xlu1 %v699_v58, %s1050_s30 }
 0xae6   : > { %706 = vrot.lane.b32.xlu1 %v699_v58, %s1051_s5 }
 0xb4c   : > { %v701_v60 = vpop.permute.xlu0 %700 }
 0xb50   : > { %v705_v61 = vpop.permute.xlu0 %704 }
 0xb51   : > { %v708_v62 = vsel %vm1130_vm2, %v701_v60, %v705_v61 }
 0xb52   : > { %v712_v26 = vmin.f32 %v698_v51, %v708_v62  ;;  %v714_v63 = vmax.f32 %v698_v51, %v708_v62 }
 0xb54   : > { %v703_v0 = vpop.permute.xlu1 %702  ;;  %v716_v1 = vsel %vm711_vm13, %v712_v26, %v714_v63 }
 0xb55   : > { %718 = vrot.lane.b32.xlu0 %v716_v1, %s1063_s20 }
 0xb58   : > { %v707_v2 = vpop.permute.xlu1 %706 }
 0xb59   : > { %v709_v3 = vsel %vm1130_vm2, %v703_v0, %v707_v2 }
 0xb5a   : > { %v713_v4 = vmin.f32 %v699_v58, %v709_v3  ;;  %v715_v5 = vmax.f32 %v699_v58, %v709_v3 }
 0xb5c   : > { %v717_v6 = vsel %vm711_vm13, %v713_v4, %v715_v5 }
 0xb5d   : > { %720 = vrot.lane.b32.xlu1 %v717_v6, %s1063_s20 }
 0xbc7   : > { %v719_v7 = vpop.permute.xlu0 %718 }
 0xbc8   : > { %v722_v8 = vmin.f32 %v716_v1, %v719_v7  ;;  %v724_v9 = vmax.f32 %v716_v1, %v719_v7 }
 0xbca   : > { %v726_v10 = vsel %vm1354_vm8, %v722_v8, %v724_v9 }
 0xbcb   : > { %728 = vrot.lane.b32.xlu0 %v726_v10, %s1061_s14 }
 0xbcf   : > { %732 = vrot.lane.b32.xlu0 %v726_v10, %s1062_s19  ;;  %v721_v11 = vpop.permute.xlu1 %720 }
 0xbd0   : > { %v723_v12 = vmin.f32 %v717_v6, %v721_v11  ;;  %v725_v13 = vmax.f32 %v717_v6, %v721_v11 }
 0xbd2   : > { %v727_v14 = vsel %vm1354_vm8, %v723_v12, %v725_v13  ;;  %v1064_v13 = vmov 0.0  }
 0xbd3   : > { %730 = vrot.lane.b32.xlu1 %v727_v14, %s1061_s14  ;;  %262 = vst.msk [vmem:[%s1503_s23] sm:$0x1] %vm261_vm5, %v1064_v13  ;;  %263 = vst.msk [vmem:[%s1509_s26] sm:$0x1] %vm261_vm5, %v1064_v13 }
 0xbd7   : > { %734 = vrot.lane.b32.xlu1 %v727_v14, %s1062_s19 }
 0xc3d   : > { %v729_v15 = vpop.permute.xlu0 %728 }
 0xc41   : > { %v733_v16 = vpop.permute.xlu0 %732 }
 0xc42   : > { %v736_v18 = vsel %vm1284_vm1, %v729_v15, %v733_v16 }
 0xc43   : > { %v738_v19 = vmin.f32 %v726_v10, %v736_v18  ;;  %v740_v20 = vmax.f32 %v726_v10, %v736_v18 }
 0xc45   : > { %v731_v21 = vpop.permute.xlu1 %730  ;;  %v742_v22 = vsel %vm1284_vm1, %v738_v19, %v740_v20 }
 0xc46   : > { %744 = vrot.lane.b32.xlu0 %v742_v22, %s1059_s12 }
 0xc49   : > { %v735_v23 = vpop.permute.xlu1 %734 }
 0xc4a   : > { %v737_v54 = vsel %vm1284_vm1, %v731_v21, %v735_v23  ;;  %748 = vrot.lane.b32.xlu0 %v742_v22, %s1060_s13 }
 0xc4b   : > { %v739_v24 = vmin.f32 %v727_v14, %v737_v54  ;;  %v741_v25 = vmax.f32 %v727_v14, %v737_v54 }
 0xc4d   : > { %v743_v27 = vsel %vm1284_vm1, %v739_v24, %v741_v25 }
 0xc4e   : > { %746 = vrot.lane.b32.xlu1 %v743_v27, %s1059_s12 }
 0xc52   : > { %750 = vrot.lane.b32.xlu1 %v743_v27, %s1060_s13 }
 0xcb8   : > { %v745_v28 = vpop.permute.xlu0 %744 }
 0xcbc   : > { %v749_v29 = vpop.permute.xlu0 %748 }
 0xcbd   : > { %v752_v30 = vsel %vm1227_vm6, %v745_v28, %v749_v29 }
 0xcbe   : > { %v754_v31 = vmin.f32 %v742_v22, %v752_v30  ;;  %v756_v32 = vmax.f32 %v742_v22, %v752_v30 }
 0xcc0   : > { %v747_v33 = vpop.permute.xlu1 %746  ;;  %v758_v34 = vsel %vm1227_vm6, %v754_v31, %v756_v32 }
 0xcc1   : > { %760 = vrot.lane.b32.xlu0 %v758_v34, %s1057_s10 }
 0xcc4   : > { %v751_v35 = vpop.permute.xlu1 %750 }
 0xcc5   : > { %v753_v49 = vsel %vm1227_vm6, %v747_v33, %v751_v35  ;;  %764 = vrot.lane.b32.xlu0 %v758_v34, %s1058_s11 }
 0xcc6   : > { %v755_v36 = vmin.f32 %v743_v27, %v753_v49  ;;  %v757_v37 = vmax.f32 %v743_v27, %v753_v49 }
 0xcc8   : > { %v759_v38 = vsel %vm1227_vm6, %v755_v36, %v757_v37 }
 0xcc9   : > { %762 = vrot.lane.b32.xlu1 %v759_v38, %s1057_s10 }
 0xccd   : > { %766 = vrot.lane.b32.xlu1 %v759_v38, %s1058_s11 }
 0xd33   : > { %v761_v39 = vpop.permute.xlu0 %760 }
 0xd37   : > { %v765_v40 = vpop.permute.xlu0 %764 }
 0xd38   : > { %v768_v43 = vsel %vm1183_vm12, %v761_v39, %v765_v40 }
 0xd39   : > { %v770_v44 = vmin.f32 %v758_v34, %v768_v43  ;;  %v772_v45 = vmax.f32 %v758_v34, %v768_v43  ;;  %v839_v43 = vld [vmem:[%s1509_s26] sm:$0x1] }
 0xd3b   : > { %v763_v46 = vpop.permute.xlu1 %762  ;;  %v774_v47 = vsel %vm1183_vm12, %v770_v44, %v772_v45 }
 0xd3c   : > { %776 = vrot.lane.b32.xlu0 %v774_v47, %s1055_s8 }
 0xd3f   : > { %v767_v48 = vpop.permute.xlu1 %766 }
 0xd40   : > { %v769_v59 = vsel %vm1183_vm12, %v763_v46, %v767_v48  ;;  %780 = vrot.lane.b32.xlu0 %v774_v47, %s1056_s9 }
 0xd41   : > { %v771_v50 = vmin.f32 %v759_v38, %v769_v59  ;;  %v773_v51 = vmax.f32 %v759_v38, %v769_v59  ;;  %v829_v38 = vld [vmem:[%s1503_s23] sm:$0x1] }
 0xd43   : > { %v775_v52 = vsel %vm1183_vm12, %v771_v50, %v773_v51 }
 0xd44   : > { %778 = vrot.lane.b32.xlu1 %v775_v52, %s1055_s8 }
 0xd48   : > { %782 = vrot.lane.b32.xlu1 %v775_v52, %s1056_s9 }
 0xdae   : > { %v777_v53 = vpop.permute.xlu0 %776 }
 0xdb2   : > { %v781_v55 = vpop.permute.xlu0 %780 }
 0xdb3   : > { %v784_v57 = vsel %vm1152_vm7, %v777_v53, %v781_v55 }
 0xdb4   : > { %v786_v58 = vmin.f32 %v774_v47, %v784_v57  ;;  %v788_v60 = vmax.f32 %v774_v47, %v784_v57 }
 0xdb6   : > { %v779_v61 = vpop.permute.xlu1 %778  ;;  %v790_v62 = vsel %vm1152_vm7, %v786_v58, %v788_v60 }
 0xdb7   : > { %792 = vrot.lane.b32.xlu0 %v790_v62, %s1053_s6 }
 0xdba   : > { %v783_v26 = vpop.permute.xlu1 %782 }
 0xdbb   : > { %v785_v17 = vsel %vm1152_vm7, %v779_v61, %v783_v26  ;;  %796 = vrot.lane.b32.xlu0 %v790_v62, %s1054_s7 }
 0xdbc   : > { %v787_v63 = vmin.f32 %v775_v52, %v785_v17  ;;  %v789_v0 = vmax.f32 %v775_v52, %v785_v17 }
 0xdbe   : > { %v791_v1 = vsel %vm1152_vm7, %v787_v63, %v789_v0 }
 0xdbf   : > { %794 = vrot.lane.b32.xlu1 %v791_v1, %s1053_s6 }
 0xdc3   : > { %798 = vrot.lane.b32.xlu1 %v791_v1, %s1054_s7 }
 0xe29   : > { %v793_v2 = vpop.permute.xlu0 %792 }
 0xe2d   : > { %v797_v3 = vpop.permute.xlu0 %796 }
 0xe2e   : > { %v800_v4 = vsel %vm1134_vm3, %v793_v2, %v797_v3 }
 0xe2f   : > { %v802_v5 = vmin.f32 %v790_v62, %v800_v4  ;;  %v804_v6 = vmax.f32 %v790_v62, %v800_v4 }
 0xe31   : > { %v795_v7 = vpop.permute.xlu1 %794  ;;  %v806_v8 = vsel %vm1134_vm3, %v802_v5, %v804_v6 }
 0xe32   : > { %808 = vrot.lane.b32.xlu0 %v806_v8, %s1050_s30 }
 0xe35   : > { %v799_v56 = vpop.permute.xlu1 %798 }
 0xe36   : > { %v801_v9 = vsel %vm1134_vm3, %v795_v7, %v799_v56  ;;  %812 = vrot.lane.b32.xlu0 %v806_v8, %s1051_s5 }
 0xe37   : > { %v803_v10 = vmin.f32 %v791_v1, %v801_v9  ;;  %v805_v11 = vmax.f32 %v791_v1, %v801_v9 }
 0xe39   : > { %v807_v12 = vsel %vm1134_vm3, %v803_v10, %v805_v11 }
 0xe3a   : > { %810 = vrot.lane.b32.xlu1 %v807_v12, %s1050_s30 }
 0xe3e   : > { %814 = vrot.lane.b32.xlu1 %v807_v12, %s1051_s5 }
 0xea4   : > { %v809_v42 = vpop.permute.xlu0 %808 }
 0xea8   : > { %v813_v14 = vpop.permute.xlu0 %812 }
 0xea9   : > { %v816_v16 = vsel %vm1130_vm2, %v809_v42, %v813_v14 }
 0xeaa   : > { %v818_v18 = vmin.f32 %v806_v8, %v816_v16  ;;  %v820_v19 = vmax.f32 %v806_v8, %v816_v16 }
 0xeac   : > { %v811_v15 = vpop.permute.xlu1 %810  ;;  %v822_v54 = vsel %vm1130_vm2, %v818_v18, %v820_v19 }
 0xeb0   : > { %v815_v20 = vpop.permute.xlu1 %814 }
 0xeb1   : > { %v817_v21 = vsel %vm1130_vm2, %v811_v15, %v815_v20 }
 0xeb2   : > { %v819_v22 = vmin.f32 %v807_v12, %v817_v21  ;;  %v821_v23 = vmax.f32 %v807_v12, %v817_v21 }
 0xeb4   : > { %v823_v24 = vsel %vm1130_vm2, %v819_v22, %v821_v23 }
 0xeb5   : > { %v824_v25 = vsub.f32 %v822_v54, %v823_v24 }
 0xeb7   : > { %v825_v27 = vand.u32 2147483647, %v824_v25 }
 0xeb9   : > { %v826_v28 = vmul.f32 %v825_v27, %v825_v27 }
 0xebb   : > { %827 = vadd.xlane.f32.xlu0 %v826_v28 }
 0xf48   : > { %v828_v29 = vpop.xlane.xlu0 %827 }
 0xf49   : > { %v830_v30 = vrot.slane %v828_v29, 4  ;;  %v840_v31 = vmul.f32 %v828_v29, %v828_v29 }
 0xf4b   : > { %v831_v32 = vadd.f32 %v830_v30, %v828_v29  ;;  %v841_v33 = vrot.slane %v840_v31, 4 }
 0xf4d   : > { %v832_v34 = vrot.slane %v831_v32, 2  ;;  %v842_v35 = vadd.f32 %v841_v33, %v840_v31 }
 0xf4f   : > { %v833_v49 = vadd.f32 %v832_v34, %v831_v32  ;;  %v843_v41 = vrot.slane %v842_v35, 2 }
 0xf51   : > { %v834_v36 = vrot.slane %v833_v49, 1  ;;  %v844_v37 = vadd.f32 %v843_v41, %v842_v35 }
 0xf53   : > { %v835_v39 = vadd.f32 %v834_v36, %v833_v49  ;;  %v845_v40 = vrot.slane %v844_v37, 1 }
 0xf55   : > { %v836_v44 = vadd.f32 %v835_v39, %v829_v38  ;;  %v846_v45 = vadd.f32 %v845_v40, %v844_v37 }
 0xf57   : > { %838 = vst.msk [vmem:[%s1503_s23] sm:$0x1] %vm261_vm5, %v836_v44  ;;  %v847_v46 = vadd.f32 %v846_v45, %v839_v43 }
 0xf59   : > { %848 = vst.msk [vmem:[%s1509_s26] sm:$0x1] %vm261_vm5, %v847_v46 }
 0xf5e   : > { %v852_v47 = vld [vmem:[%s1503_s23] sm:$0x1] }
 0xf5f   : > { %v853_v48 = vmul.f32 0.125, %v852_v47 }
 0xf60   : > { %v855_v59 = vld [vmem:[%s1509_s26] sm:$0x1] }
 0xf61   : > { %854 = vst.msk [vmem:[%s1503_s23] sm:$0x1] %vm261_vm5, %v853_v48  ;;  %v856_v50 = vmul.f32 0.125, %v855_v59 }
 0xf63   : > { %857 = vst.msk [vmem:[%s1509_s26] sm:$0x1] %vm261_vm5, %v856_v50 }
 0xf64 PF: > { %s15_s17 = sadd.s32 1, %s1045_s17   ;;  %s1564_s15 = smov %s1041_s16 }
 0xf65   : > { %p12_p5 = scmp.ge.s32.totalorder %s15_s17, 4   ;;  %s1565_s16 = smov %s1567_s18 }
 0xf67   :  { %14 = sbr.rel (!%p12_p5) target bundleno = 2 (0x2), region = 88 }

</bundles_post_ra>
